<compile_context>
chip_gen: v6e
topology: v6e:2x2x1
jax: 0.10.0
libtpu: 0.0.40
codegen_flags: <defaults>
</compile_context>

<pallas_src>
import jax
import jax.numpy as jnp
import numpy as np
from jax.experimental import pallas as pl
from jax.experimental.pallas import tpu as pltpu


# ----------------------------- Pallas kernel -----------------------------

def _make_lstm_layer_kernel(T, B, H, fuse_fc):
    """One LSTM layer for one head; optionally fuses the per-head Linear."""
    unroll = True if T <= 32 else 8

    def kernel(*refs):
        # Views (one head per grid step, leading head axis squeezed):
        #   x_ref:   (T, B, Din)   layer input (layer 0: shared across heads)
        #   wih_ref: (Din, 4H)     pre-transposed so x @ wih == x @ W_ih.T
        #   whh_ref: (H, 4H)       pre-transposed so h @ whh == h @ W_hh.T
        #   b_ref:   (1, 4H)       b_ih + b_hh
        #   [fcw_ref: (1, H), fcb_ref: (1, 1)]    only when fuse_fc
        #   out_ref: (T, B, H)  or  (T, B) when fuse_fc
        #   xg_sc:   VMEM (T, B, 4H)   precomputed input projection
        #   h_sc:    VMEM (T, B, H)    hidden-state sequence (stays on-chip)
        if fuse_fc:
            (x_ref, wih_ref, whh_ref, b_ref, fcw_ref, fcb_ref,
             out_ref, xg_sc, h_sc) = refs
        else:
            x_ref, wih_ref, whh_ref, b_ref, out_ref, xg_sc, h_sc = refs

        Din = x_ref.shape[-1]
        wih = wih_ref[...]
        whh = whh_ref[...]
        b = b_ref[...]

        # Input projection for all timesteps at once (one MXU matmul per head).
        x2 = x_ref[...].reshape(T * B, Din)
        xg = jnp.dot(x2, wih, preferred_element_type=jnp.float32) + b
        xg_sc[...] = xg.reshape(T, B, 4 * H)

        def step(t, carry):
            h, c = carry
            gates = xg_sc[t] + jnp.dot(h, whh, preferred_element_type=jnp.float32)
            i_g = jax.nn.sigmoid(gates[:, 0 * H:1 * H])
            f_g = jax.nn.sigmoid(gates[:, 1 * H:2 * H])
            g_g = jnp.tanh(gates[:, 2 * H:3 * H])
            o_g = jax.nn.sigmoid(gates[:, 3 * H:4 * H])
            c_new = f_g * c + i_g * g_g
            h_new = o_g * jnp.tanh(c_new)
            h_sc[t] = h_new
            return (h_new, c_new)

        h0 = jnp.zeros((B, H), jnp.float32)
        c0 = jnp.zeros((B, H), jnp.float32)
        jax.lax.fori_loop(0, T, step, (h0, c0), unroll=unroll)

        if fuse_fc:
            # Fused per-head Linear on the VMEM-resident hidden sequence:
            # y[t, b] = sum_h h_sc[t, b, h] * w[h] + bias   -> (T, B)
            w = fcw_ref[...]                       # (1, H)
            y = jnp.sum(h_sc[...] * w[None], axis=-1) + fcb_ref[0, 0]
            out_ref[...] = y.astype(out_ref.dtype)
        else:
            out_ref[...] = h_sc[...].astype(out_ref.dtype)

    return kernel


# ----------------------------- pallas_call wrapper -----------------------------

def lstm_stack_pallas(X, params):
    """Full forward: stacked per-head LSTM layers + fused per-head Linear.

    X: (T, B, dim_X)  ->  (T, B, dim_y)
    """
    T, B, dim_X = X.shape
    layers = params["lstm"]
    dim_y = params["fc_w"].shape[0]
    n_layers = len(layers)

    feat = X                  # layer-0 input: single copy, shared across heads
    shared_input = True
    for j, layer in enumerate(layers):
        wih_t = jnp.transpose(layer["w_ih"], (0, 2, 1))      # (dim_y, Din, 4H)
        whh_t = jnp.transpose(layer["w_hh"], (0, 2, 1))      # (dim_y, H, 4H)
        bias = (layer["b_ih"] + layer["b_hh"])[:, None, :]   # (dim_y, 1, 4H)
        Din = wih_t.shape[1]
        H = whh_t.shape[1]
        last = (j == n_layers - 1)

        if shared_input:
            # Same block for every head: no HBM broadcast, no redundant copies.
            x_spec = pl.BlockSpec((T, B, Din), lambda i: (0, 0, 0))
        else:
            x_spec = pl.BlockSpec((pl.Squeezed(), T, B, Din),
                                  lambda i: (i, 0, 0, 0))

        in_specs = [
            x_spec,
            pl.BlockSpec((pl.Squeezed(), Din, 4 * H), lambda i: (i, 0, 0)),
            pl.BlockSpec((pl.Squeezed(), H, 4 * H), lambda i: (i, 0, 0)),
            pl.BlockSpec((pl.Squeezed(), 1, 4 * H), lambda i: (i, 0, 0)),
        ]
        args = [feat, wih_t, whh_t, bias]

        if last:
            in_specs += [
                pl.BlockSpec((pl.Squeezed(), 1, H), lambda i: (i, 0, 0)),
                pl.BlockSpec((pl.Squeezed(), 1, 1), lambda i: (i, 0, 0)),
            ]
            args += [params["fc_w"], params["fc_b"]]
            out_shape = jax.ShapeDtypeStruct((dim_y, T, B), jnp.float32)
            out_spec = pl.BlockSpec((pl.Squeezed(), T, B), lambda i: (i, 0, 0))
        else:
            out_shape = jax.ShapeDtypeStruct((dim_y, T, B, H), jnp.float32)
            out_spec = pl.BlockSpec((pl.Squeezed(), T, B, H),
                                    lambda i: (i, 0, 0, 0))

        kernel = _make_lstm_layer_kernel(T, B, H, fuse_fc=last)
        feat = pl.pallas_call(
            kernel,
            out_shape=out_shape,
            grid=(dim_y,),
            in_specs=in_specs,
            out_specs=out_spec,
            scratch_shapes=[
                pltpu.VMEM((T, B, 4 * H), jnp.float32),   # xg (input projection)
                pltpu.VMEM((T, B, H), jnp.float32),       # hidden sequence
            ],
            compiler_params=pltpu.CompilerParams(
                dimension_semantics=("parallel",)),       # heads across TCs (v7x)
        )(*args)
        shared_input = False

    return jnp.transpose(feat, (1, 2, 0))                  # (T, B, dim_y)


# ----------------------------- model glue -----------------------------

def init_params(key, dim_X, dim_y, lstm):
    """Deterministic init mirroring nn.LSTM / nn.Linear shapes (U(-1/sqrt(H), 1/sqrt(H)))."""
    net_lstm = [dim_X] + list(lstm)
    params = {"lstm": []}
    for j in range(len(lstm)):
        din, h = net_lstm[j], net_lstm[j + 1]
        k = 1.0 / float(np.sqrt(h))
        key, k1, k2, k3, k4 = jax.random.split(key, 5)
        params["lstm"].append(dict(
            w_ih=jax.random.uniform(k1, (dim_y, 4 * h, din), jnp.float32, -k, k),
            w_hh=jax.random.uniform(k2, (dim_y, 4 * h, h), jnp.float32, -k, k),
            b_ih=jax.random.uniform(k3, (dim_y, 4 * h), jnp.float32, -k, k),
            b_hh=jax.random.uniform(k4, (dim_y, 4 * h), jnp.float32, -k, k),
        ))
    h_last = lstm[-1]
    kf = 1.0 / float(np.sqrt(h_last))
    key, k1, k2 = jax.random.split(key, 3)
    params["fc_w"] = jax.random.uniform(k1, (dim_y, 1, h_last), jnp.float32, -kf, kf)
    params["fc_b"] = jax.random.uniform(k2, (dim_y, 1, 1), jnp.float32, -kf, kf)
    return params


def forward(X, params):
    return lstm_stack_pallas(X, params)


def forward_ref(X, params):
    """Pure-JAX reference replicating the PyTorch forward."""
    dim_y = params["fc_w"].shape[0]
    B = X.shape[1]
    outs = []
    for i in range(dim_y):
        feat = X
        for layer in params["lstm"]:
            w_ih, w_hh = layer["w_ih"][i], layer["w_hh"][i]
            b = layer["b_ih"][i] + layer["b_hh"][i]
            H = w_hh.shape[1]

            def step(carry, x_t, w_ih=w_ih, w_hh=w_hh, b=b, H=H):
                h, c = carry
                gates = x_t @ w_ih.T + h @ w_hh.T + b
                ii = jax.nn.sigmoid(gates[:, :H])
                ff = jax.nn.sigmoid(gates[:, H:2 * H])
                gg = jnp.tanh(gates[:, 2 * H:3 * H])
                oo = jax.nn.sigmoid(gates[:, 3 * H:])
                c = ff * c + ii * gg
                h = oo * jnp.tanh(c)
                return (h, c), h

            init = (jnp.zeros((B, H), jnp.float32), jnp.zeros((B, H), jnp.float32))
            _, feat = jax.lax.scan(step, init, feat)
        y = feat @ params["fc_w"][i, 0] + params["fc_b"][i, 0, 0]  # (T, B)
        outs.append(y)
    return jnp.stack(outs, axis=-1)


if __name__ == "__main__":
    T, B, dim_X, dim_y = 8, 2, 8, 3

    key = jax.random.PRNGKey(0)
    key, kx, kp1, kp2 = jax.random.split(key, 4)
    X = jax.random.normal(kx, (T, B, dim_X), jnp.float32)

    # Single-layer config (the common case): LSTM + fused FC in one kernel.
    params1 = init_params(kp1, dim_X, dim_y, (32,))
    out1 = jax.block_until_ready(jax.jit(forward)(X, params1))
    ref1 = forward_ref(X, params1)
    np.testing.assert_allclose(np.asarray(out1), np.asarray(ref1), rtol=1e-5, atol=1e-5)
    assert out1.shape == (T, B, dim_y)

    # Two-layer config exercises the non-fused intermediate-layer path too.
    params2 = init_params(kp2, dim_X, dim_y, (32, 16))
    out2 = jax.block_until_ready(jax.jit(forward)(X, params2))
    ref2 = forward_ref(X, params2)
    np.testing.assert_allclose(np.asarray(out2), np.asarray(ref2), rtol=1e-5, atol=1e-5)
    assert out2.shape == (T, B, dim_y)

    print("KERNEL_OK")
</pallas_src>

<mosaic_0001>
module attributes {stable_mosaic.version = 11 : i64} {
  func.func @kernel(%arg0: i32, %arg1: memref<8x2x8xf32, #tpu.memory_space<vmem>>, %arg2: memref<1x8x128xf32, #tpu.memory_space<vmem>>, %arg3: memref<1x32x128xf32, #tpu.memory_space<vmem>>, %arg4: memref<1x1x128xf32, #tpu.memory_space<vmem>>, %arg5: memref<1x1x32xf32, #tpu.memory_space<vmem>>, %arg6: memref<1x1x1xf32, #tpu.memory_space<vmem>>, %arg7: memref<1x8x2xf32, #tpu.memory_space<vmem>>, %arg8: memref<8x2x128xf32, #tpu.memory_space<vmem>>, %arg9: memref<8x2x32xf32, #tpu.memory_space<vmem>>) attributes {dimension_semantics = [#tpu.dimension_semantics<parallel>], iteration_bounds = array<i64: 3>, scalar_prefetch = 0 : i64, scratch_operands = 2 : i64, tpu.core_type = #tpu.core_type<tc>, window_params = [{pipeline_mode = #tpu.pipeline_mode<synchronous>, transform_indices = @transform_0, window_bounds = array<i64: 8, 2, 8>}, {transform_indices = @transform_1, window_bounds = array<i64: 1, 8, 128>}, {transform_indices = @transform_2, window_bounds = array<i64: 1, 32, 128>}, {transform_indices = @transform_3, window_bounds = array<i64: 1, 1, 128>}, {transform_indices = @transform_4, window_bounds = array<i64: 1, 1, 32>}, {transform_indices = @transform_5, window_bounds = array<i64: 1, 1, 1>}, {transform_indices = @transform_6, window_bounds = array<i64: 1, 8, 2>}]} {
    %c0 = arith.constant 0 : index
    %c0_0 = arith.constant 0 : index
    %c0_1 = arith.constant 0 : index
    %0 = vector.load %arg2[%c0, %c0_0, %c0_1] : memref<1x8x128xf32, #tpu.memory_space<vmem>>, vector<1x8x128xf32>
    %1 = vector.shape_cast %0 : vector<1x8x128xf32> to vector<8x128xf32>
    %c0_2 = arith.constant 0 : index
    %c0_3 = arith.constant 0 : index
    %c0_4 = arith.constant 0 : index
    %2 = vector.load %arg3[%c0_2, %c0_3, %c0_4] : memref<1x32x128xf32, #tpu.memory_space<vmem>>, vector<1x32x128xf32>
    %3 = vector.shape_cast %2 : vector<1x32x128xf32> to vector<32x128xf32>
    %c0_5 = arith.constant 0 : index
    %c0_6 = arith.constant 0 : index
    %c0_7 = arith.constant 0 : index
    %4 = vector.load %arg4[%c0_5, %c0_6, %c0_7] : memref<1x1x128xf32, #tpu.memory_space<vmem>>, vector<1x1x128xf32>
    %5 = vector.shape_cast %4 : vector<1x1x128xf32> to vector<1x128xf32>
    %c0_8 = arith.constant 0 : index
    %c0_9 = arith.constant 0 : index
    %c0_10 = arith.constant 0 : index
    %6 = vector.load %arg1[%c0_8, %c0_9, %c0_10] : memref<8x2x8xf32, #tpu.memory_space<vmem>>, vector<8x2x8xf32>
    %7 = vector.shape_cast %6 : vector<8x2x8xf32> to vector<16x8xf32>
    %cst = arith.constant dense<0.000000e+00> : vector<16x128xf32>
    %8 = tpu.matmul %7, %1, %cst {dimension_numbers = #tpu.dot_dimension_numbers<[1], [0], [0], [1], [0, 0, 1, 1], [], []>} : vector<16x8xf32>, vector<8x128xf32>, vector<16x128xf32> -> vector<16x128xf32>
    %9 = vector.broadcast %5 : vector<1x128xf32> to vector<16x128xf32>
    %10 = arith.addf %8, %9 : vector<16x128xf32>
    %11 = vector.shape_cast %10 : vector<16x128xf32> to vector<8x2x128xf32>
    %c0_11 = arith.constant 0 : index
    %c0_12 = arith.constant 0 : index
    %c0_13 = arith.constant 0 : index
    %12 = vector.load %arg8[%c0_11, %c0_12, %c0_13] : memref<8x2x128xf32, #tpu.memory_space<vmem>>, vector<8x2x128xf32>
    tpu.vector_store %arg8[%c0_11, %c0_12, %c0_13], %11 {strides = array<i32>} : memref<8x2x128xf32, #tpu.memory_space<vmem>>, vector<8x2x128xf32>,
    %cst_14 = arith.constant 0.000000e+00 : f32
    %13 = vector.broadcast %cst_14 : f32 to vector<2x32xf32>
    %cst_15 = arith.constant 0.000000e+00 : f32
    %14 = vector.broadcast %cst_15 : f32 to vector<2x32xf32>
    %c0_i32 = arith.constant 0 : i32
    %15 = arith.index_cast %c0_i32 : i32 to index
    %c0_16 = arith.constant 0 : index
    %c0_17 = arith.constant 0 : index
    %16 = vector.load %arg8[%15, %c0_16, %c0_17] : memref<8x2x128xf32, #tpu.memory_space<vmem>>, vector<1x2x128xf32>
    %17 = vector.shape_cast %16 : vector<1x2x128xf32> to vector<2x128xf32>
    %cst_18 = arith.constant dense<0.000000e+00> : vector<2x128xf32>
    %18 = tpu.matmul %13, %3, %cst_18 {dimension_numbers = #tpu.dot_dimension_numbers<[1], [0], [0], [1], [0, 0, 1, 1], [], []>} : vector<2x32xf32>, vector<32x128xf32>, vector<2x128xf32> -> vector<2x128xf32>
    %19 = arith.addf %17, %18 : vector<2x128xf32>
    %20 = vector.extract_strided_slice %19 {offsets = [0, 0], sizes = [2, 32], strides = [1, 1]} : vector<2x128xf32> to vector<2x32xf32>
    %21 = arith.negf %20 : vector<2x32xf32>
    %22 = math.exp %21 : vector<2x32xf32>
    %cst_19 = arith.constant 1.000000e+00 : f32
    %23 = vector.broadcast %cst_19 : f32 to vector<2x32xf32>
    %24 = arith.addf %23, %22 : vector<2x32xf32>
    %25 = arith.divf %23, %24 : vector<2x32xf32>
    %26 = vector.extract_strided_slice %19 {offsets = [0, 32], sizes = [2, 32], strides = [1, 1]} : vector<2x128xf32> to vector<2x32xf32>
    %27 = arith.negf %26 : vector<2x32xf32>
    %28 = math.exp %27 : vector<2x32xf32>
    %cst_20 = arith.constant 1.000000e+00 : f32
    %29 = vector.broadcast %cst_20 : f32 to vector<2x32xf32>
    %30 = arith.addf %29, %28 : vector<2x32xf32>
    %31 = arith.divf %29, %30 : vector<2x32xf32>
    %32 = vector.extract_strided_slice %19 {offsets = [0, 64], sizes = [2, 32], strides = [1, 1]} : vector<2x128xf32> to vector<2x32xf32>
    %33 = math.tanh %32 : vector<2x32xf32>
    %34 = vector.extract_strided_slice %19 {offsets = [0, 96], sizes = [2, 32], strides = [1, 1]} : vector<2x128xf32> to vector<2x32xf32>
    %35 = arith.negf %34 : vector<2x32xf32>
    %36 = math.exp %35 : vector<2x32xf32>
    %cst_21 = arith.constant 1.000000e+00 : f32
    %37 = vector.broadcast %cst_21 : f32 to vector<2x32xf32>
    %38 = arith.addf %37, %36 : vector<2x32xf32>
    %39 = arith.divf %37, %38 : vector<2x32xf32>
    %40 = arith.mulf %31, %14 : vector<2x32xf32>
    %41 = arith.mulf %25, %33 : vector<2x32xf32>
    %42 = arith.addf %40, %41 : vector<2x32xf32>
    %43 = math.tanh %42 : vector<2x32xf32>
    %44 = arith.mulf %39, %43 : vector<2x32xf32>
    %45 = arith.index_cast %c0_i32 : i32 to index
    %c0_22 = arith.constant 0 : index
    %c0_23 = arith.constant 0 : index
    %46 = vector.load %arg9[%45, %c0_22, %c0_23] : memref<8x2x32xf32, #tpu.memory_space<vmem>>, vector<1x2x32xf32>
    %47 = vector.shape_cast %46 : vector<1x2x32xf32> to vector<2x32xf32>
    %48 = vector.shape_cast %44 : vector<2x32xf32> to vector<1x2x32xf32>
    tpu.vector_store %arg9[%45, %c0_22, %c0_23], %48 {strides = array<i32>} : memref<8x2x32xf32, #tpu.memory_space<vmem>>, vector<1x2x32xf32>,
    %c1_i32 = arith.constant 1 : i32
    %49 = arith.index_cast %c1_i32 : i32 to index
    %c0_24 = arith.constant 0 : index
    %c0_25 = arith.constant 0 : index
    %50 = vector.load %arg8[%49, %c0_24, %c0_25] : memref<8x2x128xf32, #tpu.memory_space<vmem>>, vector<1x2x128xf32>
    %51 = vector.shape_cast %50 : vector<1x2x128xf32> to vector<2x128xf32>
    %cst_26 = arith.constant dense<0.000000e+00> : vector<2x128xf32>
    %52 = tpu.matmul %44, %3, %cst_26 {dimension_numbers = #tpu.dot_dimension_numbers<[1], [0], [0], [1], [0, 0, 1, 1], [], []>} : vector<2x32xf32>, vector<32x128xf32>, vector<2x128xf32> -> vector<2x128xf32>
    %53 = arith.addf %51, %52 : vector<2x128xf32>
    %54 = vector.extract_strided_slice %53 {offsets = [0, 0], sizes = [2, 32], strides = [1, 1]} : vector<2x128xf32> to vector<2x32xf32>
    %55 = arith.negf %54 : vector<2x32xf32>
    %56 = math.exp %55 : vector<2x32xf32>
    %cst_27 = arith.constant 1.000000e+00 : f32
    %57 = vector.broadcast %cst_27 : f32 to vector<2x32xf32>
    %58 = arith.addf %57, %56 : vector<2x32xf32>
    %59 = arith.divf %57, %58 : vector<2x32xf32>
    %60 = vector.extract_strided_slice %53 {offsets = [0, 32], sizes = [2, 32], strides = [1, 1]} : vector<2x128xf32> to vector<2x32xf32>
    %61 = arith.negf %60 : vector<2x32xf32>
    %62 = math.exp %61 : vector<2x32xf32>
    %cst_28 = arith.constant 1.000000e+00 : f32
    %63 = vector.broadcast %cst_28 : f32 to vector<2x32xf32>
    %64 = arith.addf %63, %62 : vector<2x32xf32>
    %65 = arith.divf %63, %64 : vector<2x32xf32>
    %66 = vector.extract_strided_slice %53 {offsets = [0, 64], sizes = [2, 32], strides = [1, 1]} : vector<2x128xf32> to vector<2x32xf32>
    %67 = math.tanh %66 : vector<2x32xf32>
    %68 = vector.extract_strided_slice %53 {offsets = [0, 96], sizes = [2, 32], strides = [1, 1]} : vector<2x128xf32> to vector<2x32xf32>
    %69 = arith.negf %68 : vector<2x32xf32>
    %70 = math.exp %69 : vector<2x32xf32>
    %cst_29 = arith.constant 1.000000e+00 : f32
    %71 = vector.broadcast %cst_29 : f32 to vector<2x32xf32>
    %72 = arith.addf %71, %70 : vector<2x32xf32>
    %73 = arith.divf %71, %72 : vector<2x32xf32>
    %74 = arith.mulf %65, %42 : vector<2x32xf32>
    %75 = arith.mulf %59, %67 : vector<2x32xf32>
    %76 = arith.addf %74, %75 : vector<2x32xf32>
    %77 = math.tanh %76 : vector<2x32xf32>
    %78 = arith.mulf %73, %77 : vector<2x32xf32>
    %79 = arith.index_cast %c1_i32 : i32 to index
    %c0_30 = arith.constant 0 : index
    %c0_31 = arith.constant 0 : index
    %80 = vector.load %arg9[%79, %c0_30, %c0_31] : memref<8x2x32xf32, #tpu.memory_space<vmem>>, vector<1x2x32xf32>
    %81 = vector.shape_cast %80 : vector<1x2x32xf32> to vector<2x32xf32>
    %82 = vector.shape_cast %78 : vector<2x32xf32> to vector<1x2x32xf32>
    tpu.vector_store %arg9[%79, %c0_30, %c0_31], %82 {strides = array<i32>} : memref<8x2x32xf32, #tpu.memory_space<vmem>>, vector<1x2x32xf32>,
    %c2_i32 = arith.constant 2 : i32
    %83 = arith.index_cast %c2_i32 : i32 to index
    %c0_32 = arith.constant 0 : index
    %c0_33 = arith.constant 0 : index
    %84 = vector.load %arg8[%83, %c0_32, %c0_33] : memref<8x2x128xf32, #tpu.memory_space<vmem>>, vector<1x2x128xf32>
    %85 = vector.shape_cast %84 : vector<1x2x128xf32> to vector<2x128xf32>
    %cst_34 = arith.constant dense<0.000000e+00> : vector<2x128xf32>
    %86 = tpu.matmul %78, %3, %cst_34 {dimension_numbers = #tpu.dot_dimension_numbers<[1], [0], [0], [1], [0, 0, 1, 1], [], []>} : vector<2x32xf32>, vector<32x128xf32>, vector<2x128xf32> -> vector<2x128xf32>
    %87 = arith.addf %85, %86 : vector<2x128xf32>
    %88 = vector.extract_strided_slice %87 {offsets = [0, 0], sizes = [2, 32], strides = [1, 1]} : vector<2x128xf32> to vector<2x32xf32>
    %89 = arith.negf %88 : vector<2x32xf32>
    %90 = math.exp %89 : vector<2x32xf32>
    %cst_35 = arith.constant 1.000000e+00 : f32
    %91 = vector.broadcast %cst_35 : f32 to vector<2x32xf32>
    %92 = arith.addf %91, %90 : vector<2x32xf32>
    %93 = arith.divf %91, %92 : vector<2x32xf32>
    %94 = vector.extract_strided_slice %87 {offsets = [0, 32], sizes = [2, 32], strides = [1, 1]} : vector<2x128xf32> to vector<2x32xf32>
    %95 = arith.negf %94 : vector<2x32xf32>
    %96 = math.exp %95 : vector<2x32xf32>
    %cst_36 = arith.constant 1.000000e+00 : f32
    %97 = vector.broadcast %cst_36 : f32 to vector<2x32xf32>
    %98 = arith.addf %97, %96 : vector<2x32xf32>
    %99 = arith.divf %97, %98 : vector<2x32xf32>
    %100 = vector.extract_strided_slice %87 {offsets = [0, 64], sizes = [2, 32], strides = [1, 1]} : vector<2x128xf32> to vector<2x32xf32>
    %101 = math.tanh %100 : vector<2x32xf32>
    %102 = vector.extract_strided_slice %87 {offsets = [0, 96], sizes = [2, 32], strides = [1, 1]} : vector<2x128xf32> to vector<2x32xf32>
    %103 = arith.negf %102 : vector<2x32xf32>
    %104 = math.exp %103 : vector<2x32xf32>
    %cst_37 = arith.constant 1.000000e+00 : f32
    %105 = vector.broadcast %cst_37 : f32 to vector<2x32xf32>
    %106 = arith.addf %105, %104 : vector<2x32xf32>
    %107 = arith.divf %105, %106 : vector<2x32xf32>
    %108 = arith.mulf %99, %76 : vector<2x32xf32>
    %109 = arith.mulf %93, %101 : vector<2x32xf32>
    %110 = arith.addf %108, %109 : vector<2x32xf32>
    %111 = math.tanh %110 : vector<2x32xf32>
    %112 = arith.mulf %107, %111 : vector<2x32xf32>
    %113 = arith.index_cast %c2_i32 : i32 to index
    %c0_38 = arith.constant 0 : index
    %c0_39 = arith.constant 0 : index
    %114 = vector.load %arg9[%113, %c0_38, %c0_39] : memref<8x2x32xf32, #tpu.memory_space<vmem>>, vector<1x2x32xf32>
    %115 = vector.shape_cast %114 : vector<1x2x32xf32> to vector<2x32xf32>
    %116 = vector.shape_cast %112 : vector<2x32xf32> to vector<1x2x32xf32>
    tpu.vector_store %arg9[%113, %c0_38, %c0_39], %116 {strides = array<i32>} : memref<8x2x32xf32, #tpu.memory_space<vmem>>, vector<1x2x32xf32>,
    %c3_i32 = arith.constant 3 : i32
    %117 = arith.index_cast %c3_i32 : i32 to index
    %c0_40 = arith.constant 0 : index
    %c0_41 = arith.constant 0 : index
    %118 = vector.load %arg8[%117, %c0_40, %c0_41] : memref<8x2x128xf32, #tpu.memory_space<vmem>>, vector<1x2x128xf32>
    %119 = vector.shape_cast %118 : vector<1x2x128xf32> to vector<2x128xf32>
    %cst_42 = arith.constant dense<0.000000e+00> : vector<2x128xf32>
    %120 = tpu.matmul %112, %3, %cst_42 {dimension_numbers = #tpu.dot_dimension_numbers<[1], [0], [0], [1], [0, 0, 1, 1], [], []>} : vector<2x32xf32>, vector<32x128xf32>, vector<2x128xf32> -> vector<2x128xf32>
    %121 = arith.addf %119, %120 : vector<2x128xf32>
    %122 = vector.extract_strided_slice %121 {offsets = [0, 0], sizes = [2, 32], strides = [1, 1]} : vector<2x128xf32> to vector<2x32xf32>
    %123 = arith.negf %122 : vector<2x32xf32>
    %124 = math.exp %123 : vector<2x32xf32>
    %cst_43 = arith.constant 1.000000e+00 : f32
    %125 = vector.broadcast %cst_43 : f32 to vector<2x32xf32>
    %126 = arith.addf %125, %124 : vector<2x32xf32>
    %127 = arith.divf %125, %126 : vector<2x32xf32>
    %128 = vector.extract_strided_slice %121 {offsets = [0, 32], sizes = [2, 32], strides = [1, 1]} : vector<2x128xf32> to vector<2x32xf32>
    %129 = arith.negf %128 : vector<2x32xf32>
    %130 = math.exp %129 : vector<2x32xf32>
    %cst_44 = arith.constant 1.000000e+00 : f32
    %131 = vector.broadcast %cst_44 : f32 to vector<2x32xf32>
    %132 = arith.addf %131, %130 : vector<2x32xf32>
    %133 = arith.divf %131, %132 : vector<2x32xf32>
    %134 = vector.extract_strided_slice %121 {offsets = [0, 64], sizes = [2, 32], strides = [1, 1]} : vector<2x128xf32> to vector<2x32xf32>
    %135 = math.tanh %134 : vector<2x32xf32>
    %136 = vector.extract_strided_slice %121 {offsets = [0, 96], sizes = [2, 32], strides = [1, 1]} : vector<2x128xf32> to vector<2x32xf32>
    %137 = arith.negf %136 : vector<2x32xf32>
    %138 = math.exp %137 : vector<2x32xf32>
    %cst_45 = arith.constant 1.000000e+00 : f32
    %139 = vector.broadcast %cst_45 : f32 to vector<2x32xf32>
    %140 = arith.addf %139, %138 : vector<2x32xf32>
    %141 = arith.divf %139, %140 : vector<2x32xf32>
    %142 = arith.mulf %133, %110 : vector<2x32xf32>
    %143 = arith.mulf %127, %135 : vector<2x32xf32>
    %144 = arith.addf %142, %143 : vector<2x32xf32>
    %145 = math.tanh %144 : vector<2x32xf32>
    %146 = arith.mulf %141, %145 : vector<2x32xf32>
    %147 = arith.index_cast %c3_i32 : i32 to index
    %c0_46 = arith.constant 0 : index
    %c0_47 = arith.constant 0 : index
    %148 = vector.load %arg9[%147, %c0_46, %c0_47] : memref<8x2x32xf32, #tpu.memory_space<vmem>>, vector<1x2x32xf32>
    %149 = vector.shape_cast %148 : vector<1x2x32xf32> to vector<2x32xf32>
    %150 = vector.shape_cast %146 : vector<2x32xf32> to vector<1x2x32xf32>
    tpu.vector_store %arg9[%147, %c0_46, %c0_47], %150 {strides = array<i32>} : memref<8x2x32xf32, #tpu.memory_space<vmem>>, vector<1x2x32xf32>,
    %c4_i32 = arith.constant 4 : i32
    %151 = arith.index_cast %c4_i32 : i32 to index
    %c0_48 = arith.constant 0 : index
    %c0_49 = arith.constant 0 : index
    %152 = vector.load %arg8[%151, %c0_48, %c0_49] : memref<8x2x128xf32, #tpu.memory_space<vmem>>, vector<1x2x128xf32>
    %153 = vector.shape_cast %152 : vector<1x2x128xf32> to vector<2x128xf32>
    %cst_50 = arith.constant dense<0.000000e+00> : vector<2x128xf32>
    %154 = tpu.matmul %146, %3, %cst_50 {dimension_numbers = #tpu.dot_dimension_numbers<[1], [0], [0], [1], [0, 0, 1, 1], [], []>} : vector<2x32xf32>, vector<32x128xf32>, vector<2x128xf32> -> vector<2x128xf32>
    %155 = arith.addf %153, %154 : vector<2x128xf32>
    %156 = vector.extract_strided_slice %155 {offsets = [0, 0], sizes = [2, 32], strides = [1, 1]} : vector<2x128xf32> to vector<2x32xf32>
    %157 = arith.negf %156 : vector<2x32xf32>
    %158 = math.exp %157 : vector<2x32xf32>
    %cst_51 = arith.constant 1.000000e+00 : f32
    %159 = vector.broadcast %cst_51 : f32 to vector<2x32xf32>
    %160 = arith.addf %159, %158 : vector<2x32xf32>
    %161 = arith.divf %159, %160 : vector<2x32xf32>
    %162 = vector.extract_strided_slice %155 {offsets = [0, 32], sizes = [2, 32], strides = [1, 1]} : vector<2x128xf32> to vector<2x32xf32>
    %163 = arith.negf %162 : vector<2x32xf32>
    %164 = math.exp %163 : vector<2x32xf32>
    %cst_52 = arith.constant 1.000000e+00 : f32
    %165 = vector.broadcast %cst_52 : f32 to vector<2x32xf32>
    %166 = arith.addf %165, %164 : vector<2x32xf32>
    %167 = arith.divf %165, %166 : vector<2x32xf32>
    %168 = vector.extract_strided_slice %155 {offsets = [0, 64], sizes = [2, 32], strides = [1, 1]} : vector<2x128xf32> to vector<2x32xf32>
    %169 = math.tanh %168 : vector<2x32xf32>
    %170 = vector.extract_strided_slice %155 {offsets = [0, 96], sizes = [2, 32], strides = [1, 1]} : vector<2x128xf32> to vector<2x32xf32>
    %171 = arith.negf %170 : vector<2x32xf32>
    %172 = math.exp %171 : vector<2x32xf32>
    %cst_53 = arith.constant 1.000000e+00 : f32
    %173 = vector.broadcast %cst_53 : f32 to vector<2x32xf32>
    %174 = arith.addf %173, %172 : vector<2x32xf32>
    %175 = arith.divf %173, %174 : vector<2x32xf32>
    %176 = arith.mulf %167, %144 : vector<2x32xf32>
    %177 = arith.mulf %161, %169 : vector<2x32xf32>
    %178 = arith.addf %176, %177 : vector<2x32xf32>
    %179 = math.tanh %178 : vector<2x32xf32>
    %180 = arith.mulf %175, %179 : vector<2x32xf32>
    %181 = arith.index_cast %c4_i32 : i32 to index
    %c0_54 = arith.constant 0 : index
    %c0_55 = arith.constant 0 : index
    %182 = vector.load %arg9[%181, %c0_54, %c0_55] : memref<8x2x32xf32, #tpu.memory_space<vmem>>, vector<1x2x32xf32>
    %183 = vector.shape_cast %182 : vector<1x2x32xf32> to vector<2x32xf32>
    %184 = vector.shape_cast %180 : vector<2x32xf32> to vector<1x2x32xf32>
    tpu.vector_store %arg9[%181, %c0_54, %c0_55], %184 {strides = array<i32>} : memref<8x2x32xf32, #tpu.memory_space<vmem>>, vector<1x2x32xf32>,
    %c5_i32 = arith.constant 5 : i32
    %185 = arith.index_cast %c5_i32 : i32 to index
    %c0_56 = arith.constant 0 : index
    %c0_57 = arith.constant 0 : index
    %186 = vector.load %arg8[%185, %c0_56, %c0_57] : memref<8x2x128xf32, #tpu.memory_space<vmem>>, vector<1x2x128xf32>
    %187 = vector.shape_cast %186 : vector<1x2x128xf32> to vector<2x128xf32>
    %cst_58 = arith.constant dense<0.000000e+00> : vector<2x128xf32>
    %188 = tpu.matmul %180, %3, %cst_58 {dimension_numbers = #tpu.dot_dimension_numbers<[1], [0], [0], [1], [0, 0, 1, 1], [], []>} : vector<2x32xf32>, vector<32x128xf32>, vector<2x128xf32> -> vector<2x128xf32>
    %189 = arith.addf %187, %188 : vector<2x128xf32>
    %190 = vector.extract_strided_slice %189 {offsets = [0, 0], sizes = [2, 32], strides = [1, 1]} : vector<2x128xf32> to vector<2x32xf32>
    %191 = arith.negf %190 : vector<2x32xf32>
    %192 = math.exp %191 : vector<2x32xf32>
    %cst_59 = arith.constant 1.000000e+00 : f32
    %193 = vector.broadcast %cst_59 : f32 to vector<2x32xf32>
    %194 = arith.addf %193, %192 : vector<2x32xf32>
    %195 = arith.divf %193, %194 : vector<2x32xf32>
    %196 = vector.extract_strided_slice %189 {offsets = [0, 32], sizes = [2, 32], strides = [1, 1]} : vector<2x128xf32> to vector<2x32xf32>
    %197 = arith.negf %196 : vector<2x32xf32>
    %198 = math.exp %197 : vector<2x32xf32>
    %cst_60 = arith.constant 1.000000e+00 : f32
    %199 = vector.broadcast %cst_60 : f32 to vector<2x32xf32>
    %200 = arith.addf %199, %198 : vector<2x32xf32>
    %201 = arith.divf %199, %200 : vector<2x32xf32>
    %202 = vector.extract_strided_slice %189 {offsets = [0, 64], sizes = [2, 32], strides = [1, 1]} : vector<2x128xf32> to vector<2x32xf32>
    %203 = math.tanh %202 : vector<2x32xf32>
    %204 = vector.extract_strided_slice %189 {offsets = [0, 96], sizes = [2, 32], strides = [1, 1]} : vector<2x128xf32> to vector<2x32xf32>
    %205 = arith.negf %204 : vector<2x32xf32>
    %206 = math.exp %205 : vector<2x32xf32>
    %cst_61 = arith.constant 1.000000e+00 : f32
    %207 = vector.broadcast %cst_61 : f32 to vector<2x32xf32>
    %208 = arith.addf %207, %206 : vector<2x32xf32>
    %209 = arith.divf %207, %208 : vector<2x32xf32>
    %210 = arith.mulf %201, %178 : vector<2x32xf32>
    %211 = arith.mulf %195, %203 : vector<2x32xf32>
    %212 = arith.addf %210, %211 : vector<2x32xf32>
    %213 = math.tanh %212 : vector<2x32xf32>
    %214 = arith.mulf %209, %213 : vector<2x32xf32>
    %215 = arith.index_cast %c5_i32 : i32 to index
    %c0_62 = arith.constant 0 : index
    %c0_63 = arith.constant 0 : index
    %216 = vector.load %arg9[%215, %c0_62, %c0_63] : memref<8x2x32xf32, #tpu.memory_space<vmem>>, vector<1x2x32xf32>
    %217 = vector.shape_cast %216 : vector<1x2x32xf32> to vector<2x32xf32>
    %218 = vector.shape_cast %214 : vector<2x32xf32> to vector<1x2x32xf32>
    tpu.vector_store %arg9[%215, %c0_62, %c0_63], %218 {strides = array<i32>} : memref<8x2x32xf32, #tpu.memory_space<vmem>>, vector<1x2x32xf32>,
    %c6_i32 = arith.constant 6 : i32
    %219 = arith.index_cast %c6_i32 : i32 to index
    %c0_64 = arith.constant 0 : index
    %c0_65 = arith.constant 0 : index
    %220 = vector.load %arg8[%219, %c0_64, %c0_65] : memref<8x2x128xf32, #tpu.memory_space<vmem>>, vector<1x2x128xf32>
    %221 = vector.shape_cast %220 : vector<1x2x128xf32> to vector<2x128xf32>
    %cst_66 = arith.constant dense<0.000000e+00> : vector<2x128xf32>
    %222 = tpu.matmul %214, %3, %cst_66 {dimension_numbers = #tpu.dot_dimension_numbers<[1], [0], [0], [1], [0, 0, 1, 1], [], []>} : vector<2x32xf32>, vector<32x128xf32>, vector<2x128xf32> -> vector<2x128xf32>
    %223 = arith.addf %221, %222 : vector<2x128xf32>
    %224 = vector.extract_strided_slice %223 {offsets = [0, 0], sizes = [2, 32], strides = [1, 1]} : vector<2x128xf32> to vector<2x32xf32>
    %225 = arith.negf %224 : vector<2x32xf32>
    %226 = math.exp %225 : vector<2x32xf32>
    %cst_67 = arith.constant 1.000000e+00 : f32
    %227 = vector.broadcast %cst_67 : f32 to vector<2x32xf32>
    %228 = arith.addf %227, %226 : vector<2x32xf32>
    %229 = arith.divf %227, %228 : vector<2x32xf32>
    %230 = vector.extract_strided_slice %223 {offsets = [0, 32], sizes = [2, 32], strides = [1, 1]} : vector<2x128xf32> to vector<2x32xf32>
    %231 = arith.negf %230 : vector<2x32xf32>
    %232 = math.exp %231 : vector<2x32xf32>
    %cst_68 = arith.constant 1.000000e+00 : f32
    %233 = vector.broadcast %cst_68 : f32 to vector<2x32xf32>
    %234 = arith.addf %233, %232 : vector<2x32xf32>
    %235 = arith.divf %233, %234 : vector<2x32xf32>
    %236 = vector.extract_strided_slice %223 {offsets = [0, 64], sizes = [2, 32], strides = [1, 1]} : vector<2x128xf32> to vector<2x32xf32>
    %237 = math.tanh %236 : vector<2x32xf32>
    %238 = vector.extract_strided_slice %223 {offsets = [0, 96], sizes = [2, 32], strides = [1, 1]} : vector<2x128xf32> to vector<2x32xf32>
    %239 = arith.negf %238 : vector<2x32xf32>
    %240 = math.exp %239 : vector<2x32xf32>
    %cst_69 = arith.constant 1.000000e+00 : f32
    %241 = vector.broadcast %cst_69 : f32 to vector<2x32xf32>
    %242 = arith.addf %241, %240 : vector<2x32xf32>
    %243 = arith.divf %241, %242 : vector<2x32xf32>
    %244 = arith.mulf %235, %212 : vector<2x32xf32>
    %245 = arith.mulf %229, %237 : vector<2x32xf32>
    %246 = arith.addf %244, %245 : vector<2x32xf32>
    %247 = math.tanh %246 : vector<2x32xf32>
    %248 = arith.mulf %243, %247 : vector<2x32xf32>
    %249 = arith.index_cast %c6_i32 : i32 to index
    %c0_70 = arith.constant 0 : index
    %c0_71 = arith.constant 0 : index
    %250 = vector.load %arg9[%249, %c0_70, %c0_71] : memref<8x2x32xf32, #tpu.memory_space<vmem>>, vector<1x2x32xf32>
    %251 = vector.shape_cast %250 : vector<1x2x32xf32> to vector<2x32xf32>
    %252 = vector.shape_cast %248 : vector<2x32xf32> to vector<1x2x32xf32>
    tpu.vector_store %arg9[%249, %c0_70, %c0_71], %252 {strides = array<i32>} : memref<8x2x32xf32, #tpu.memory_space<vmem>>, vector<1x2x32xf32>,
    %c7_i32 = arith.constant 7 : i32
    %253 = arith.index_cast %c7_i32 : i32 to index
    %c0_72 = arith.constant 0 : index
    %c0_73 = arith.constant 0 : index
    %254 = vector.load %arg8[%253, %c0_72, %c0_73] : memref<8x2x128xf32, #tpu.memory_space<vmem>>, vector<1x2x128xf32>
    %255 = vector.shape_cast %254 : vector<1x2x128xf32> to vector<2x128xf32>
    %cst_74 = arith.constant dense<0.000000e+00> : vector<2x128xf32>
    %256 = tpu.matmul %248, %3, %cst_74 {dimension_numbers = #tpu.dot_dimension_numbers<[1], [0], [0], [1], [0, 0, 1, 1], [], []>} : vector<2x32xf32>, vector<32x128xf32>, vector<2x128xf32> -> vector<2x128xf32>
    %257 = arith.addf %255, %256 : vector<2x128xf32>
    %258 = vector.extract_strided_slice %257 {offsets = [0, 0], sizes = [2, 32], strides = [1, 1]} : vector<2x128xf32> to vector<2x32xf32>
    %259 = arith.negf %258 : vector<2x32xf32>
    %260 = math.exp %259 : vector<2x32xf32>
    %cst_75 = arith.constant 1.000000e+00 : f32
    %261 = vector.broadcast %cst_75 : f32 to vector<2x32xf32>
    %262 = arith.addf %261, %260 : vector<2x32xf32>
    %263 = arith.divf %261, %262 : vector<2x32xf32>
    %264 = vector.extract_strided_slice %257 {offsets = [0, 32], sizes = [2, 32], strides = [1, 1]} : vector<2x128xf32> to vector<2x32xf32>
    %265 = arith.negf %264 : vector<2x32xf32>
    %266 = math.exp %265 : vector<2x32xf32>
    %cst_76 = arith.constant 1.000000e+00 : f32
    %267 = vector.broadcast %cst_76 : f32 to vector<2x32xf32>
    %268 = arith.addf %267, %266 : vector<2x32xf32>
    %269 = arith.divf %267, %268 : vector<2x32xf32>
    %270 = vector.extract_strided_slice %257 {offsets = [0, 64], sizes = [2, 32], strides = [1, 1]} : vector<2x128xf32> to vector<2x32xf32>
    %271 = math.tanh %270 : vector<2x32xf32>
    %272 = vector.extract_strided_slice %257 {offsets = [0, 96], sizes = [2, 32], strides = [1, 1]} : vector<2x128xf32> to vector<2x32xf32>
    %273 = arith.negf %272 : vector<2x32xf32>
    %274 = math.exp %273 : vector<2x32xf32>
    %cst_77 = arith.constant 1.000000e+00 : f32
    %275 = vector.broadcast %cst_77 : f32 to vector<2x32xf32>
    %276 = arith.addf %275, %274 : vector<2x32xf32>
    %277 = arith.divf %275, %276 : vector<2x32xf32>
    %278 = arith.mulf %269, %246 : vector<2x32xf32>
    %279 = arith.mulf %263, %271 : vector<2x32xf32>
    %280 = arith.addf %278, %279 : vector<2x32xf32>
    %281 = math.tanh %280 : vector<2x32xf32>
    %282 = arith.mulf %277, %281 : vector<2x32xf32>
    %283 = arith.index_cast %c7_i32 : i32 to index
    %c0_78 = arith.constant 0 : index
    %c0_79 = arith.constant 0 : index
    %284 = vector.load %arg9[%283, %c0_78, %c0_79] : memref<8x2x32xf32, #tpu.memory_space<vmem>>, vector<1x2x32xf32>
    %285 = vector.shape_cast %284 : vector<1x2x32xf32> to vector<2x32xf32>
    %286 = vector.shape_cast %282 : vector<2x32xf32> to vector<1x2x32xf32>
    tpu.vector_store %arg9[%283, %c0_78, %c0_79], %286 {strides = array<i32>} : memref<8x2x32xf32, #tpu.memory_space<vmem>>, vector<1x2x32xf32>,
    %c8_i32 = arith.constant 8 : i32
    %c0_80 = arith.constant 0 : index
    %c0_81 = arith.constant 0 : index
    %c0_82 = arith.constant 0 : index
    %287 = vector.load %arg5[%c0_80, %c0_81, %c0_82] : memref<1x1x32xf32, #tpu.memory_space<vmem>>, vector<1x1x32xf32>
    %288 = vector.shape_cast %287 : vector<1x1x32xf32> to vector<1x32xf32>
    %c0_83 = arith.constant 0 : index
    %c0_84 = arith.constant 0 : index
    %c0_85 = arith.constant 0 : index
    %289 = vector.load %arg9[%c0_83, %c0_84, %c0_85] : memref<8x2x32xf32, #tpu.memory_space<vmem>>, vector<8x2x32xf32>
    %290 = vector.shape_cast %288 : vector<1x32xf32> to vector<1x1x32xf32>
    %291 = vector.broadcast %290 : vector<1x1x32xf32> to vector<8x2x32xf32>
    %292 = arith.mulf %289, %291 : vector<8x2x32xf32>
    %cst_86 = arith.constant dense<0.000000e+00> : vector<8x2xf32>
    %293 = vector.multi_reduction <add>, %292, %cst_86 [2] : vector<8x2x32xf32> to vector<8x2xf32>
    %c0_87 = arith.constant 0 : index
    %c0_88 = arith.constant 0 : index
    %c0_89 = arith.constant 0 : index
    %294 = vector.load %arg6[%c0_87, %c0_88, %c0_89] : memref<1x1x1xf32, #tpu.memory_space<vmem>>, vector<1x1x1xf32>
    %295 = vector.extract %294[0, 0, 0] : f32 from vector<1x1x1xf32>
    %296 = vector.broadcast %295 : f32 to vector<8x2xf32>
    %297 = arith.addf %293, %296 : vector<8x2xf32>
    %c0_90 = arith.constant 0 : index
    %c0_91 = arith.constant 0 : index
    %c0_92 = arith.constant 0 : index
    %298 = vector.load %arg7[%c0_90, %c0_91, %c0_92] : memref<1x8x2xf32, #tpu.memory_space<vmem>>, vector<1x8x2xf32>
    %299 = vector.shape_cast %298 : vector<1x8x2xf32> to vector<8x2xf32>
    %300 = vector.shape_cast %297 : vector<8x2xf32> to vector<1x8x2xf32>
    tpu.vector_store %arg7[%c0_90, %c0_91, %c0_92], %300 {strides = array<i32>} : memref<1x8x2xf32, #tpu.memory_space<vmem>>, vector<1x8x2xf32>,
    return
  }
  func.func @transform_0(%arg0: i32) -> (i32, i32, i32) {
    %c0_i32 = arith.constant 0 : i32
    %c0_i32_0 = arith.constant 0 : i32
    %c0_i32_1 = arith.constant 0 : i32
    %c0_i32_2 = arith.constant 0 : i32
    return %c0_i32, %c0_i32_0, %c0_i32_1 : i32, i32, i32
  }
  func.func @transform_1(%arg0: i32) -> (i32, i32, i32) {
    %c0_i32 = arith.constant 0 : i32
    %c0_i32_0 = arith.constant 0 : i32
    %c0_i32_1 = arith.constant 0 : i32
    return %arg0, %c0_i32, %c0_i32_0 : i32, i32, i32
  }
  func.func @transform_2(%arg0: i32) -> (i32, i32, i32) {
    %c0_i32 = arith.constant 0 : i32
    %c0_i32_0 = arith.constant 0 : i32
    %c0_i32_1 = arith.constant 0 : i32
    return %arg0, %c0_i32, %c0_i32_0 : i32, i32, i32
  }
  func.func @transform_3(%arg0: i32) -> (i32, i32, i32) {
    %c0_i32 = arith.constant 0 : i32
    %c0_i32_0 = arith.constant 0 : i32
    %c0_i32_1 = arith.constant 0 : i32
    return %arg0, %c0_i32, %c0_i32_0 : i32, i32, i32
  }
  func.func @transform_4(%arg0: i32) -> (i32, i32, i32) {
    %c0_i32 = arith.constant 0 : i32
    %c0_i32_0 = arith.constant 0 : i32
    %c0_i32_1 = arith.constant 0 : i32
    return %arg0, %c0_i32, %c0_i32_0 : i32, i32, i32
  }
  func.func @transform_5(%arg0: i32) -> (i32, i32, i32) {
    %c0_i32 = arith.constant 0 : i32
    %c0_i32_0 = arith.constant 0 : i32
    %c0_i32_1 = arith.constant 0 : i32
    return %arg0, %c0_i32, %c0_i32_0 : i32, i32, i32
  }
  func.func @transform_6(%arg0: i32) -> (i32, i32, i32) {
    %c0_i32 = arith.constant 0 : i32
    %c0_i32_0 = arith.constant 0 : i32
    %c0_i32_1 = arith.constant 0 : i32
    return %arg0, %c0_i32, %c0_i32_0 : i32, i32, i32
  }
}

</mosaic_0001>

<bundles_post_ra>
// kernel: forward.1
= control target key start
LH: loop header
LB: loop body
LE: loop exit
PB: predicated region body
PF: predicated region fallthrough
CT: control target
= control target key end

     0   :  { %11 = vsyncpa [#allocation5], 0  ;;  %s2365_s0 = inlined_call_operand.hbm [shape: f32[8,2,8], index: 0, kind: input, shape index: {}]   ;;  %s2366_s1 = inlined_call_operand.vmem [shape: f32[3,8,128], index: 1, kind: input, shape index: {}]   ;;  %s2367_s2 = inlined_call_operand.hbm [shape: f32[3,32,128], index: 2, kind: input, shape index: {}]   ;;  %s2368_s3 = inlined_call_operand.vmem [shape: f32[3,1,128], index: 3, kind: input, shape index: {}]   ;;  %s2369_s4 = inlined_call_operand.vmem [shape: f32[3,1,32], index: 4, kind: input, shape index: {}]   ;;  %s2370_s5 = inlined_call_operand.vmem [shape: f32[3,1,1], index: 5, kind: input, shape index: {}]   ;;  %s2371_s6 = inlined_call_operand.vmem [shape: f32[3,8,2], index: 6, kind: output, shape index: {}]  }
   0x1   :  { %12 = vsyncpa [#allocation7], 0 }
   0x2   :  { %14 = vsyncpa [#allocation7 + $0x1], 0  ;;  %s2051_s21 = smov 0   ;;  %s2053_s22 = smov 0  }
   0x3   :  { %s2055_s23 = smov 0   ;;  %s2057_s24 = smov 0  }
   0x4 LB: > { %s2070_s25 = sadd.s32 4294967295, %s2003_s24   ;;  %p87_p0 = scmp.ne.s32.totalorder %s1995_s22, %s1991_s21  ;;  %s2003_s24 = sphi %s2057_s24, %s2386_s24   ;;  %s1999_s23 = sphi %s2055_s23, %s2385_s23   ;;  %s1995_s22 = sphi %s2053_s22, %s2384_s22   ;;  %s1991_s21 = sphi %s2051_s21, %s2383_s21  }
   0x5   : > { %p2372_p1 = scmp.eq.s32.totalorder %s2070_s25, 0  ;;  %p1613_p2 = scmp.ge.s32.totalorder %s2003_s24, 1 }
   0x6   : > { %p202_p3 = scmp.lt.s32.totalorder %s2003_s24, 4  ;;  %s2005_s28 = smov [#allocation4]  }
   0x7   : > { %p2078_p4 = por %p2372_p1, %p87_p0  ;;  %s214_s29 = sshll.u32 %s2005_s28, 4  ;;  %s215_s29 = int_to_ptr.vmem [resolvable:$true] %s214_s29 }
   0x8   : > { %p2082_p5 = pnand %p1613_p2, %p202_p3  ;;  %s2095_s7 = sadd.s32 1, %s2003_s24  }
   0x9   : > { %s2375_s26 = scalar_select %p2078_p4, 1, 0 }
   0xa   : > { %s2376_s27 = scalar_select %p2082_p5, 1, 0 }
   0xb   : > { %p1794_p6 = pneg %p2082_p5  ;;  %s74_s8 = sadd.s32 1, %s1999_s23 }
   0xc   : > { %s71_s9 = ssub.s32 %s2003_s24, %s2095_s7  ;;  %s1922_s10 = scalar_lea.vmem %s215_s29, 256 }
   0xd   : > { %p2090_p7 = pnand %p1794_p6, %p2372_p1  ;;  %p1923_p9 = scmp.ne.s32.totalorder %s215_s29, %s1922_s10 }
   0xe   : > { %p1930_p12 = scmp.lt.s32.totalorder %s215_s29, %s215_s29  ;;  %p1931_p13 = scmp.lt.s32.totalorder %s1922_s10, %s1922_s10 }
   0xf   : > { %p1913_p8 = pneg %p2090_p7 }
  0x10   : > { %p1932_p0 = por %p1931_p13, %p1930_p12 }
  0x11   : > { %p1925_p10 = pnand %p1923_p9, %p1913_p8 }
  0x13   : > { %p1926_p11 = pneg %p1925_p10 }
  0x15   : > { %p1933_p2 = pnand %p1932_p0, %p1926_p11 }
  0x17   : > { %1936 = shalt.err (!%p1933_p2)
}
  0x18   : > { %s2006_s11 = smov 32   ;;  %s2007_s12 = smov 2  }
  0x19   : > { %1797 = dma.hbm_to_vmem [thread:$0]  (!%p2090_p7), %s2365_s0, 256, %s215_s29, [#allocation5], %s2006_s11, %s2006_s11, %s2007_s12  }
  0x1a   : > { %p72_p3 = scmp.eq.s32.totalorder %s71_s9, 0  ;;  %p81_p6 = scmp.ne.s32.totalorder %s1999_s23, %s1995_s22 }
  0x1b   : > { %p82_p8 = scmp.eq.s32.totalorder %s2003_s24, 0  ;;  %p1803_p9 = scmp.lt.s32.totalorder %s2003_s24, 3 }
  0x1c   : > { %s2112_s15 = scalar_select %p72_p3, %s1999_s23, %s74_s8  }
  0x1d   : > { %p83_p10 = por %p82_p8, %p81_p6  ;;  %s235_s16 = sand.u32 1, %s1999_s23  }
  0x1e   : > { %s1616_s17 = sshll.u32 %s235_s16, 5  ;;  %s1649_s18 = sshll.u32 %s2003_s24, 9 }
  0x1f   : > { %s2119_s21 = scalar_lea.hbm %s2367_s2, %s1649_s18  ;;  %s239_s28 = scalar_lea.vmem [#allocation6], %s1616_s17 }
  0x20   : > { %s246_s29 = sshll.u32 %s239_s28, 4  ;;  %p2123_p7 = pnand %p1803_p9, %p83_p10  ;;  %s2121_s29 = int_to_ptr.vmem [resolvable:$true] %s246_s29 }
  0x21   : > { %s2127_s8 = scalar_lea.sflag [#allocation7], %s235_s16  ;;  %s1937_s24 = scalar_lea.hbm %s2119_s21, 512 }
  0x22   : > { %p1938_p11 = scmp.ne.s32.totalorder %s2119_s21, %s1937_s24  ;;  %p1939_p12 = pneg %p2123_p7 }
  0x23   : > { %s1942_s11 = scalar_lea.hbm %s2367_s2, 1536  ;;  %p1943_p2 = scmp.lt.s32.totalorder %s2119_s21, %s2367_s2 }
  0x24   : > { %p1940_p13 = pnand %p1939_p12, %p1938_p11  ;;  %p1944_p3 = scmp.lt.s32.totalorder %s1942_s11, %s1937_s24 }
  0x26   : > { %p1941_p0 = pneg %p1940_p13  ;;  %p1945_p6 = por %p1944_p3, %p1943_p2 }
  0x28   : > { %p1946_p8 = pnand %p1945_p6, %p1941_p0 }
  0x2a   : > { %1949 = shalt.err (!%p1946_p8)
}
  0x2b   : > { %s1950_s14 = scalar_lea.vmem %s2121_s29, 512  ;;  %s2008_s16 = smov [#allocation6]  }
  0x2c   : > { %p1951_p9 = scmp.ne.s32.totalorder %s2121_s29, %s1950_s14  ;;  %s1955_s17 = sshll.u32 %s2008_s16, 4  ;;  %s1956_s17 = int_to_ptr.vmem [resolvable:$false] %s1955_s17 }
  0x2d   : > { %s1957_s18 = scalar_lea.vmem %s1956_s17, 1024  ;;  %p1958_p13 = scmp.lt.s32.totalorder %s2121_s29, %s1956_s17 }
  0x2e   : > { %p1953_p10 = pnand %p1951_p9, %p1939_p12  ;;  %p1959_p1 = scmp.lt.s32.totalorder %s1957_s18, %s1950_s14 }
  0x30   : > { %p1954_p11 = pneg %p1953_p10  ;;  %p1960_p4 = por %p1959_p1, %p1958_p13 }
  0x32   : > { %p1961_p5 = pnand %p1960_p4, %p1954_p11 }
  0x34   : > { %1964 = shalt.err (!%p1961_p5)
}
  0x35   : > { %s2009_s19 = smov 128   ;;  %s2010_s20 = smov 8  }
  0x36   : > { %1801 = dma.hbm_to_vmem [thread:$0]  (!%p2123_p7), %s2119_s21, 512, %s2121_s29, %s2127_s8, %s2009_s19, %s2009_s19, %s2010_s20  }
  0x37   : > { %p2379_p12 = scmp.ne.s32.totalorder %s2376_s27, 0 }
  0x38   : > { %p2380_p0 = scmp.eq.s32.totalorder (!%p2379_p12), %s2070_s25, 0 }
  0x39   : > { %276 = sbr.rel (%p2379_p12) target bundleno = 5759 (0x167f), region = 44 }
  0x3e   : > { %1982 = dma.done.wait (%p2380_p0), [#allocation5], 256   ;;  %p2381_p2 = pmov %p2380_p0 }
  0x3f   : > { %s282_s28 = sand.u32 1, %s1995_s22   ;;  %p2382_p1 = scmp.ne.s32.totalorder %s2375_s26, 0 }
  0x40   : > { %1984 = vsyncadd (%p2381_p2), [#allocation5], 4294967040  ;;  %s1621_s24 = sshll.u32 %s282_s28, 5  ;;  %s283_s9 = scalar_lea.sflag [#allocation7], %s282_s28 }
  0x41   : > { %s2155_s10 = scalar_lea.vmem [#allocation6], %s1621_s24 }
  0x42   : > { %1986 = dma.done.wait (%p2382_p1), %s283_s9, 512  }
  0x43   : > { %1988 = vsyncadd (%p2382_p1), %s283_s9, 4294966784  ;;  %p327_p4 = scmp.lt.s32.totalorder %s2070_s25, 2  ;;  %v377_v0 = vlaneseq  ;;  %v2011_v1 = vmov 1983009808   ;;  %v2012_v3 = vmov 0.0   ;;  %vm2013_vm0 = vmmov 0  }
  0x44   : > { %v375_v2 = vunpack.c.l.s4 %v2011_v1  ;;  %1698 = vmatprep.subr.mxu1 %v2012_v3  ;;  %1706 = vmatprep.mubr.msk.f32.mxu1 %vm2013_vm0, %v2012_v3  ;;  %v350_v8 = vld [vmem:[#allocation4] sm:$0x3]  ;;  %v351_v9 = vld [vmem:[#allocation4 + $0x2] sm:$0x3]  ;;  %v352_v10 = vld [vmem:[#allocation4 + $0x4] sm:$0x3] }
  0x45   : > { %s2388_s25 = smov (!%p327_p4, %s2070_s25), 2  ;;  %v2167_v4 = vshrl.u32 %v377_v0, 7  ;;  %v353_v11 = vld [vmem:[#allocation4 + $0x6] sm:$0x3]  ;;  %v372_v12 = vcombine.low %v350_v8, %v351_v9  ;;  %v354_v13 = vld [vmem:[#allocation4 + $0x8] sm:$0x3] }
  0x46   : > { %v376_v5 = vunpack.c.0.s8 %v375_v2  ;;  %s1622_s26 = sshll.u32 %s2388_s25, 3  ;;  %v373_v14 = vcombine.low %v352_v10, %v353_v11  ;;  %v355_v15 = vld [vmem:[#allocation4 + $0xa] sm:$0x3]  ;;  %v356_v16 = vld [vmem:[#allocation4 + $0xc] sm:$0x3]  ;;  %v2185_v22 = vld [vmem:[%s2155_s10 + $0x10] sm:$0xff]  ;;  %s333_s11 = scalar_lea.vmem %s2368_s3, %s2388_s25 }
  0x47   : > { %s330_s29 = scalar_lea.vmem %s2366_s1, %s1622_s26  ;;  %v357_v17 = vld [vmem:[#allocation4 + $0xe] sm:$0x3]  ;;  %v389_v19 = vcombine.low %v354_v13, %v355_v15  ;;  %vm406_vm1 = vcmask 64512   ;;  %v2194_v26 = vld [vmem:[%s2155_s10 + $0x8] sm:$0xff]  ;;  %v2199_v29 = vld [vmem:[%s2155_s10] sm:$0xff]  ;;  %s2014_s12 = smov 64  }
  0x48   : > { %v2178_v6 = vsub.s32 %v376_v5, %v2167_v4  ;;  %v344_v7 = vld [vmem:[%s330_s29] sm:$0xff]  ;;  %v390_v20 = vcombine.low %v356_v16, %v357_v17  ;;  %v2182_v21 = vld [vmem:[%s2155_s10 + $0x18] sm:$0xff]  ;;  %s2015_s13 = smov 32   ;;  %vm642_vm2 = vcmask 254976   ;;  %vm539_vm3 = vcmask 261120   ;;  %s339_s17 = scalar_lea.vmem %s2370_s5, %s2388_s25 }
  0x49   : > { %1693 = vmatprep.subr.mxu0 %v344_v7  ;;  %1699 = vmatpush3.msra.mxu1 %v2182_v21  ;;  %v1624_v30 = vld [vmem:[%s333_s11] ss:$0 sm:$0xff]  ;;  %s336_s20 = scalar_lea.vmem %s2369_s4, %s2388_s25  ;;  %vm1479_vm4 = vcmask 1041409   ;;  %vm1481_vm5 = vcmask 1042434   ;;  %vm1483_vm6 = vcmask 1043459   ;;  %vm1485_vm7 = vcmask 1044484   ;;  %s343_s10 = scalar_lea.vmem %s2371_s6, %s1622_s26 }
  0x4a   : > { %1694 = vmatpush3.msra.mxu0 %v344_v7  ;;  %v380_v18 = vrot.slane %v372_v12, %v2178_v6  ;;  %v387_v23 = vrot.slane %v373_v14, %v2178_v6  ;;  %v397_v24 = vrot.slane %v389_v19, %v2178_v6  ;;  %v404_v25 = vrot.slane %v390_v20, %v2178_v6 }
  0x4b   : > { %1709 = vmatprep.subr.mxu0 %v2012_v3  ;;  %1700 = vmatprep.subr.mxu1 %v2012_v3  ;;  %vm1487_vm8 = vcmask 1045509   ;;  %vm1489_vm9 = vcmask 1046534   ;;  %vm1491_vm10 = vcmask 1047559   ;;  %vm1494_vm11 = vcmask 15360  }
  0x4c   : > { %v388_v27 = vcombine.low %v380_v18, %v387_v23  ;;  %1701 = vmatpush3.msra.mxu1 %v2185_v22  ;;  %v405_v28 = vcombine.low %v397_v24, %v404_v25 }
  0x4d   : > { %1702 = vmatprep.subr.mxu1 %v2012_v3 }
  0x4e   : > { %1695 = vmatprep.mubr.msk.f32.mxu0 %vm406_vm1, %v388_v27  ;;  %1703 = vmatpush3.msra.mxu1 %v2194_v26 }
  0x4f   : > { %1696 = vmatmul.mubr.msk.f32.vlgmr.msra.gmra.mxu0 %vm406_vm1, %v405_v28  ;;  %1704 = vmatprep.subr.mxu1 %v2012_v3 }
  0x50   : > { %1705 = vmatpush3.msra.mxu1 %v2199_v29  ;;  %1710 = vmatpush3.msra.mxu0 %v2182_v21 }
  0x51   : > { %1707 = vmatmul.mubr.f32.vlgmr.msra.gmra.mxu1 %v2012_v3  ;;  %1711 = vmatprep.subr.mxu0 %v2012_v3 }
  0x52   : > { %1712 = vmatpush3.msra.mxu0 %v2185_v22  ;;  %1717 = vmatprep.mubr.msk.f32.mxu0 %vm2013_vm0, %v2012_v3 }
  0x53   : > { %1713 = vmatprep.subr.mxu0 %v2012_v3  ;;  %1720 = vmatprep.subr.mxu1 %v2012_v3 }
  0x54   : > { %1714 = vmatpush3.msra.mxu0 %v2194_v26  ;;  %1721 = vmatpush3.msra.mxu1 %v2182_v21 }
  0x55   : > { %1715 = vmatprep.subr.mxu0 %v2012_v3  ;;  %1722 = vmatprep.subr.mxu1 %v2012_v3 }
  0x56   : > { %1716 = vmatpush3.msra.mxu0 %v2199_v29  ;;  %1723 = vmatpush3.msra.mxu1 %v2185_v22 }
  0x57   : > { %1724 = vmatprep.subr.mxu1 %v2012_v3  ;;  %1728 = vmatprep.mubr.msk.f32.mxu1 %vm2013_vm0, %v2012_v3 }
  0x58   : > { %1725 = vmatpush3.msra.mxu1 %v2194_v26  ;;  %1731 = vmatprep.subr.mxu0 %v2012_v3 }
  0x59   : > { %1726 = vmatprep.subr.mxu1 %v2012_v3 }
  0x5a   : > { %1727 = vmatpush3.msra.mxu1 %v2199_v29 }
  0x5b   : > { %1742 = vmatprep.subr.mxu1 %v2012_v3 }
 0x10f   : > { %v1697_v31 = vpop.f32.mrf.mxu0 }
 0x110   : > { %v483_v32 = vadd.f32 %v1697_v31, %v1624_v30 }
 0x111   : > { %v477_v33 = vpop.f32.mrf.mxu0  ;;  %v609_v34 = vpop.f32.mrf.mxu1 }
 0x112   : > { %v505_v35 = vcombine.high %v483_v32, %v483_v32  ;;  %v512_v36 = vrot.slane %v483_v32, %v2178_v6  ;;  %1629 = vst.sshfl [vmem:[#allocation2 + $0x8] sm:$0x3 pattern:$0x76325410] %v483_v32  ;;  %v478_v37 = vadd.f32 %v1624_v30, %v477_v33 }
 0x113   : > { %v1708_v38 = vpop.f32.mrf.mxu1 }
 0x114   : > { %v519_v39 = vrot.slane %v505_v35, %v2178_v6  ;;  %v520_v40 = vcombine.high %v512_v36, %v512_v36  ;;  %1630 = vst.sshfl [vmem:[#allocation2 + $0xc] sm:$0x3 pattern:$0x76325410] %v505_v35  ;;  %v488_v41 = vcombine.high %v478_v37, %v478_v37  ;;  %v495_v42 = vrot.slane %v478_v37, %v2178_v6 }
 0x115   : > { %1627 = vst.sshfl [vmem:[#allocation2] sm:$0x3 pattern:$0x76325410] %v478_v37 }
 0x116   : > { %v521_v43 = vcombine.high %v519_v39, %v519_v39  ;;  %535 = vst [vmem:[#allocation2 + $0xa] sm:$0x3] %v520_v40  ;;  %v502_v44 = vrot.slane %v488_v41, %v2178_v6  ;;  %v503_v45 = vcombine.high %v495_v42, %v495_v42  ;;  %1628 = vst.sshfl [vmem:[#allocation2 + $0x4] sm:$0x3 pattern:$0x76325410] %v488_v41 }
 0x118   : > { %537 = vst [vmem:[#allocation2 + $0xe] sm:$0x3] %v521_v43  ;;  %v504_v46 = vcombine.high %v502_v44, %v502_v44  ;;  %531 = vst [vmem:[#allocation2 + $0x2] sm:$0x3] %v503_v45 }
 0x11a   : > { %533 = vst [vmem:[#allocation2 + $0x6] sm:$0x3] %v504_v46 }
 0x11c   : > { %v538_v47 = vld [vmem:[#allocation2] sm:$0x3] }
 0x11d   : > { %v613_v48 = vadd.f32 %v609_v34, %v538_v47  ;;  %v750_v20 = vld [vmem:[#allocation2 + $0x4] sm:$0x3] }
 0x11f   : > { %1847 = vtanh.f32 %v613_v48  ;;  %v1631_v50 = vmul.f32 -1.442695, %v613_v48  ;;  %v645_v63 = vld [vmem:[#allocation2 + $0x2] sm:$0x3] }
 0x121   : > { %1849 = vpow2.f32 %v1631_v50  ;;  %v855_v42 = vld [vmem:[#allocation2 + $0x6] sm:$0x3] }
 0x12c   : > { %v1848_v49 = vpop.eup %1847 }
 0x12d   : > { %623 = vrot.lane.b32.xlu0 %v1848_v49, %s2014_s12 }
 0x12e   : > { %v1850_v51 = vpop.eup %1849 }
 0x12f   : > { %v617_v52 = vadd.f32 1.0, %v1850_v51 }
 0x131   : > { %1851 = vrcp.f32 %v617_v52 }
 0x13e   : > { %v1852_v53 = vpop.eup %1851 }
 0x13f   : > { %v621_v56 = vmul.f32 0.0, %v1852_v53 }
 0x19f   : > { %v624_v54 = vpop.permute.xlu0 %623 }
 0x1a0   : > { %v626_v55 = vmul.f32 %v1852_v53, %v624_v54 }
 0x1a2   : > { %628 = vrot.lane.b32.xlu0 %v626_v55, %s2015_s13 }
 0x214   : > { %v629_v57 = vpop.permute.xlu0 %628 }
 0x215   : > { %v631_v58 = vadd.f32 %v629_v57, %v621_v56 }
 0x217   : > { %1853 = vtanh.f32 %v631_v58 }
 0x224   : > { %v1854_v59 = vpop.eup %1853 }
 0x225   : > { %634 = vrot.lane.b32.xlu1 %v1854_v59, %s2014_s12 }
 0x297   : > { %v635_v60 = vpop.permute.xlu1 %634 }
 0x298   : > { %v637_v61 = vmul.f32 %v1852_v53, %v635_v60  ;;  %v960_v60 = vld [vmem:[#allocation2 + $0x8] sm:$0x3] }
 0x29a   : > { %639 = vrot.lane.b32.xlu1 %v637_v61, %s2015_s13 }
 0x30c   : > { %v640_v62 = vpop.permute.xlu1 %639 }
 0x30d   : > { %643 = vst.msk [vmem:[#allocation3] sm:$0x3] %vm642_vm2, %v640_v62  ;;  %1718 = vmatmul.mubr.msk.f32.vlgmr.msra.gmra.mxu0 %vm539_vm3, %v640_v62 }
 0x30e   : > { %1732 = vmatpush3.msra.mxu0 %v2182_v21  ;;  %1739 = vmatprep.mubr.msk.f32.mxu0 %vm2013_vm0, %v2012_v3 }
 0x30f   : > { %1733 = vmatprep.subr.mxu0 %v2012_v3 }
 0x310   : > { %1734 = vmatpush3.msra.mxu0 %v2185_v22 }
 0x311   : > { %1735 = vmatprep.subr.mxu0 %v2012_v3 }
 0x312   : > { %1736 = vmatpush3.msra.mxu0 %v2194_v26 }
 0x313   : > { %1737 = vmatprep.subr.mxu0 %v2012_v3 }
 0x314   : > { %1738 = vmatpush3.msra.mxu0 %v2199_v29 }
 0x315   : > { %1753 = vmatprep.subr.mxu0 %v2012_v3 }
 0x3cd   : > { %v714_v1 = vpop.f32.mrf.mxu0 }
 0x3ce   : > { %v718_v2 = vadd.f32 %v714_v1, %v645_v63 }
 0x3cf   : > { %v1719_v5 = vpop.f32.mrf.mxu0 }
 0x3d0   : > { %1855 = vtanh.f32 %v718_v2  ;;  %v1633_v7 = vmul.f32 -1.442695, %v718_v2 }
 0x3d2   : > { %1857 = vpow2.f32 %v1633_v7 }
 0x3dd   : > { %v1856_v6 = vpop.eup %1855 }
 0x3de   : > { %728 = vrot.lane.b32.xlu0 %v1856_v6, %s2014_s12 }
 0x3df   : > { %v1858_v8 = vpop.eup %1857 }
 0x3e0   : > { %v722_v9 = vadd.f32 1.0, %v1858_v8 }
 0x3e2   : > { %1859 = vrcp.f32 %v722_v9 }
 0x3ef   : > { %v1860_v10 = vpop.eup %1859 }
 0x3f0   : > { %v726_v13 = vmul.f32 %v1860_v10, %v631_v58 }
 0x450   : > { %v729_v11 = vpop.permute.xlu0 %728 }
 0x451   : > { %v731_v12 = vmul.f32 %v1860_v10, %v729_v11 }
 0x453   : > { %733 = vrot.lane.b32.xlu1 %v731_v12, %s2015_s13 }
 0x4c5   : > { %v734_v14 = vpop.permute.xlu1 %733 }
 0x4c6   : > { %v736_v15 = vadd.f32 %v734_v14, %v726_v13 }
 0x4c8   : > { %1861 = vtanh.f32 %v736_v15 }
 0x4d5   : > { %v1862_v16 = vpop.eup %1861 }
 0x4d6   : > { %739 = vrot.lane.b32.xlu0 %v1862_v16, %s2014_s12 }
 0x548   : > { %v740_v17 = vpop.permute.xlu0 %739 }
 0x549   : > { %v742_v18 = vmul.f32 %v1860_v10, %v740_v17  ;;  %v1065_v17 = vld [vmem:[#allocation2 + $0xa] sm:$0x3] }
 0x54b   : > { %744 = vrot.lane.b32.xlu1 %v742_v18, %s2015_s13 }
 0x5bd   : > { %v745_v19 = vpop.permute.xlu1 %744 }
 0x5be   : > { %748 = vst.msk [vmem:[#allocation3 + $0x2] sm:$0x3] %vm642_vm2, %v745_v19  ;;  %1729 = vmatmul.mubr.msk.f32.vlgmr.msra.gmra.mxu1 %vm539_vm3, %v745_v19 }
 0x5bf   : > { %1743 = vmatpush3.msra.mxu1 %v2182_v21  ;;  %1750 = vmatprep.mubr.msk.f32.mxu1 %vm2013_vm0, %v2012_v3 }
 0x5c0   : > { %1744 = vmatprep.subr.mxu1 %v2012_v3 }
 0x5c1   : > { %1745 = vmatpush3.msra.mxu1 %v2185_v22 }
 0x5c2   : > { %1746 = vmatprep.subr.mxu1 %v2012_v3 }
 0x5c3   : > { %1747 = vmatpush3.msra.mxu1 %v2194_v26 }
 0x5c4   : > { %1748 = vmatprep.subr.mxu1 %v2012_v3 }
 0x5c5   : > { %1749 = vmatpush3.msra.mxu1 %v2199_v29 }
 0x5c6   : > { %1764 = vmatprep.subr.mxu1 %v2012_v3 }
 0x67e   : > { %v819_v23 = vpop.f32.mrf.mxu1 }
 0x67f   : > { %v823_v24 = vadd.f32 %v819_v23, %v750_v20 }
 0x680   : > { %v1730_v25 = vpop.f32.mrf.mxu1 }
 0x681   : > { %1863 = vtanh.f32 %v823_v24  ;;  %v1635_v28 = vmul.f32 -1.442695, %v823_v24 }
 0x683   : > { %1865 = vpow2.f32 %v1635_v28 }
 0x68e   : > { %v1864_v27 = vpop.eup %1863 }
 0x68f   : > { %833 = vrot.lane.b32.xlu0 %v1864_v27, %s2014_s12 }
 0x690   : > { %v1866_v30 = vpop.eup %1865 }
 0x691   : > { %v827_v31 = vadd.f32 1.0, %v1866_v30 }
 0x693   : > { %1867 = vrcp.f32 %v827_v31 }
 0x6a0   : > { %v1868_v32 = vpop.eup %1867 }
 0x6a1   : > { %v831_v35 = vmul.f32 %v1868_v32, %v736_v15 }
 0x701   : > { %v834_v33 = vpop.permute.xlu0 %833 }
 0x702   : > { %v836_v34 = vmul.f32 %v1868_v32, %v834_v33 }
 0x704   : > { %838 = vrot.lane.b32.xlu1 %v836_v34, %s2015_s13  ;;  %v1170_v34 = vld [vmem:[#allocation2 + $0xc] sm:$0x3] }
 0x776   : > { %v839_v36 = vpop.permute.xlu1 %838 }
 0x777   : > { %v841_v37 = vadd.f32 %v839_v36, %v831_v35 }
 0x779   : > { %1869 = vtanh.f32 %v841_v37 }
 0x786   : > { %v1870_v38 = vpop.eup %1869 }
 0x787   : > { %844 = vrot.lane.b32.xlu0 %v1870_v38, %s2014_s12 }
 0x7f9   : > { %v845_v39 = vpop.permute.xlu0 %844 }
 0x7fa   : > { %v847_v40 = vmul.f32 %v1868_v32, %v845_v39 }
 0x7fc   : > { %849 = vrot.lane.b32.xlu1 %v847_v40, %s2015_s13 }
 0x86e   : > { %v850_v41 = vpop.permute.xlu1 %849 }
 0x86f   : > { %853 = vst.msk [vmem:[#allocation3 + $0x4] sm:$0x3] %vm642_vm2, %v850_v41  ;;  %1740 = vmatmul.mubr.msk.f32.vlgmr.msra.gmra.mxu0 %vm539_vm3, %v850_v41 }
 0x870   : > { %1754 = vmatpush3.msra.mxu0 %v2182_v21  ;;  %1761 = vmatprep.mubr.msk.f32.mxu0 %vm2013_vm0, %v2012_v3 }
 0x871   : > { %1755 = vmatprep.subr.mxu0 %v2012_v3 }
 0x872   : > { %1756 = vmatpush3.msra.mxu0 %v2185_v22 }
 0x873   : > { %1757 = vmatprep.subr.mxu0 %v2012_v3 }
 0x874   : > { %1758 = vmatpush3.msra.mxu0 %v2194_v26 }
 0x875   : > { %1759 = vmatprep.subr.mxu0 %v2012_v3 }
 0x876   : > { %1760 = vmatpush3.msra.mxu0 %v2199_v29 }
 0x877   : > { %1775 = vmatprep.subr.mxu0 %v2012_v3 }
 0x92f   : > { %v924_v43 = vpop.f32.mrf.mxu0 }
 0x930   : > { %v928_v44 = vadd.f32 %v924_v43, %v855_v42 }
 0x931   : > { %v1741_v45 = vpop.f32.mrf.mxu0 }
 0x932   : > { %1871 = vtanh.f32 %v928_v44  ;;  %v1637_v47 = vmul.f32 -1.442695, %v928_v44 }
 0x934   : > { %1873 = vpow2.f32 %v1637_v47 }
 0x93f   : > { %v1872_v46 = vpop.eup %1871 }
 0x940   : > { %938 = vrot.lane.b32.xlu0 %v1872_v46, %s2014_s12 }
 0x941   : > { %v1874_v48 = vpop.eup %1873 }
 0x942   : > { %v932_v49 = vadd.f32 1.0, %v1874_v48 }
 0x944   : > { %1875 = vrcp.f32 %v932_v49 }
 0x951   : > { %v1876_v50 = vpop.eup %1875 }
 0x952   : > { %v936_v53 = vmul.f32 %v1876_v50, %v841_v37 }
 0x9b2   : > { %v939_v51 = vpop.permute.xlu0 %938 }
 0x9b3   : > { %v941_v52 = vmul.f32 %v1876_v50, %v939_v51 }
 0x9b5   : > { %943 = vrot.lane.b32.xlu1 %v941_v52, %s2015_s13  ;;  %v1275_v52 = vld [vmem:[#allocation2 + $0xe] sm:$0x3] }
 0xa27   : > { %v944_v54 = vpop.permute.xlu1 %943 }
 0xa28   : > { %v946_v55 = vadd.f32 %v944_v54, %v936_v53 }
 0xa2a   : > { %1877 = vtanh.f32 %v946_v55 }
 0xa37   : > { %v1878_v56 = vpop.eup %1877 }
 0xa38   : > { %949 = vrot.lane.b32.xlu0 %v1878_v56, %s2014_s12 }
 0xaaa   : > { %v950_v57 = vpop.permute.xlu0 %949 }
 0xaab   : > { %v952_v58 = vmul.f32 %v1876_v50, %v950_v57 }
 0xaad   : > { %954 = vrot.lane.b32.xlu1 %v952_v58, %s2015_s13 }
 0xb1f   : > { %v955_v59 = vpop.permute.xlu1 %954 }
 0xb20   : > { %958 = vst.msk [vmem:[#allocation3 + $0x6] sm:$0x3] %vm642_vm2, %v955_v59  ;;  %1751 = vmatmul.mubr.msk.f32.vlgmr.msra.gmra.mxu1 %vm539_vm3, %v955_v59 }
 0xb21   : > { %1765 = vmatpush3.msra.mxu1 %v2182_v21  ;;  %1772 = vmatprep.mubr.msk.f32.mxu1 %vm2013_vm0, %v2012_v3 }
 0xb22   : > { %1766 = vmatprep.subr.mxu1 %v2012_v3 }
 0xb23   : > { %1767 = vmatpush3.msra.mxu1 %v2185_v22 }
 0xb24   : > { %1768 = vmatprep.subr.mxu1 %v2012_v3 }
 0xb25   : > { %1769 = vmatpush3.msra.mxu1 %v2194_v26 }
 0xb26   : > { %1770 = vmatprep.subr.mxu1 %v2012_v3 }
 0xb27   : > { %1771 = vmatpush3.msra.mxu1 %v2199_v29 }
 0xbe0   : > { %v1029_v61 = vpop.f32.mrf.mxu1 }
 0xbe1   : > { %v1033_v62 = vadd.f32 %v1029_v61, %v960_v60 }
 0xbe2   : > { %v1752_v63 = vpop.f32.mrf.mxu1 }
 0xbe3   : > { %1879 = vtanh.f32 %v1033_v62  ;;  %v1639_v2 = vmul.f32 -1.442695, %v1033_v62 }
 0xbe5   : > { %1881 = vpow2.f32 %v1639_v2 }
 0xbf0   : > { %v1880_v1 = vpop.eup %1879 }
 0xbf1   : > { %1043 = vrot.lane.b32.xlu0 %v1880_v1, %s2014_s12 }
 0xbf2   : > { %v1882_v5 = vpop.eup %1881 }
 0xbf3   : > { %v1037_v6 = vadd.f32 1.0, %v1882_v5  ;;  %v1426_v5 = vld [vmem:[%s339_s17] sm:$0x1] }
 0xbf4   : > { %1786 = vpush %v1426_v5 }
 0xbf5   : > { %1883 = vrcp.f32 %v1037_v6 }
 0xc02   : > { %v1884_v7 = vpop.eup %1883 }
 0xc03   : > { %v1041_v10 = vmul.f32 %v1884_v7, %v946_v55 }
 0xc25   : > { %s1787_s28 = spop %1786 }
 0xc63   : > { %v1044_v8 = vpop.permute.xlu0 %1043 }
 0xc64   : > { %v1046_v9 = vmul.f32 %v1884_v7, %v1044_v8  ;;  %v1380_v8 = vld [vmem:[#allocation3] sm:$0x3] }
 0xc66   : > { %1048 = vrot.lane.b32.xlu1 %v1046_v9, %s2015_s13 }
 0xcd8   : > { %v1049_v11 = vpop.permute.xlu1 %1048 }
 0xcd9   : > { %v1051_v12 = vadd.f32 %v1049_v11, %v1041_v10  ;;  %v1382_v10 = vld [vmem:[#allocation3 + $0x4] sm:$0x3] }
 0xcdb   : > { %1885 = vtanh.f32 %v1051_v12 }
 0xce8   : > { %v1886_v13 = vpop.eup %1885 }
 0xce9   : > { %1054 = vrot.lane.b32.xlu0 %v1886_v13, %s2014_s12  ;;  %v1383_v13 = vld [vmem:[#allocation3 + $0x6] sm:$0x3] }
 0xd5b   : > { %v1055_v14 = vpop.permute.xlu0 %1054 }
 0xd5c   : > { %v1057_v15 = vmul.f32 %v1884_v7, %v1055_v14  ;;  %v1646_v7 = vld [vmem:[%s336_s20] ss:$0 sm:$0xff] }
 0xd5d   : > { %v1394_v9 = vmul.f32 %v1646_v7, %v1380_v8 }
 0xd5e   : > { %1059 = vrot.lane.b32.xlu1 %v1057_v15, %s2015_s13  ;;  %v1397_v15 = vmul.f32 %v1646_v7, %v1383_v13 }
 0xd5f   : > { %v1402_v11 = vsel %vm642_vm2, %v1394_v9, 0.0 }
 0xdd0   : > { %v1060_v16 = vpop.permute.xlu1 %1059 }
 0xdd1   : > { %1063 = vst.msk [vmem:[#allocation3 + $0x8] sm:$0x3] %vm642_vm2, %v1060_v16  ;;  %1762 = vmatmul.mubr.msk.f32.vlgmr.msra.gmra.mxu0 %vm539_vm3, %v1060_v16 }
 0xdd2   : > { %1776 = vmatpush3.msra.mxu0 %v2182_v21  ;;  %1783 = vmatprep.mubr.msk.f32.mxu0 %vm2013_vm0, %v2012_v3 }
 0xdd3   : > { %1777 = vmatprep.subr.mxu0 %v2012_v3 }
 0xdd4   : > { %1778 = vmatpush3.msra.mxu0 %v2185_v22 }
 0xdd5   : > { %1779 = vmatprep.subr.mxu0 %v2012_v3 }
 0xdd6   : > { %1780 = vmatpush3.msra.mxu0 %v2194_v26 }
 0xdd7   : > { %1781 = vmatprep.subr.mxu0 %v2012_v3 }
 0xdd8   : > { %1782 = vmatpush3.msra.mxu0 %v2199_v29 }
 0xe91   : > { %v1134_v18 = vpop.f32.mrf.mxu0 }
 0xe92   : > { %v1138_v19 = vadd.f32 %v1134_v18, %v1065_v17  ;;  %v1411_v17 = vsel %vm642_vm2, %v1397_v15, 0.0 }
 0xe93   : > { %v1763_v20 = vpop.f32.mrf.mxu0 }
 0xe94   : > { %1887 = vtanh.f32 %v1138_v19  ;;  %v1641_v23 = vmul.f32 -1.442695, %v1138_v19 }
 0xe96   : > { %1889 = vpow2.f32 %v1641_v23  ;;  %v1381_v23 = vld [vmem:[#allocation3 + $0x2] sm:$0x3] }
 0xea1   : > { %v1888_v21 = vpop.eup %1887 }
 0xea2   : > { %1148 = vrot.lane.b32.xlu0 %v1888_v21, %s2014_s12 }
 0xea3   : > { %v1890_v24 = vpop.eup %1889 }
 0xea4   : > { %v1142_v22 = vadd.f32 1.0, %v1890_v24  ;;  %v1395_v24 = vmul.f32 %v1646_v7, %v1381_v23 }
 0xea6   : > { %1891 = vrcp.f32 %v1142_v22  ;;  %v1384_v22 = vld [vmem:[#allocation3 + $0x8] sm:$0x3] }
 0xeb3   : > { %v1892_v25 = vpop.eup %1891 }
 0xeb4   : > { %v1146_v3 = vmul.f32 %v1892_v25, %v1051_v12  ;;  %v1396_v12 = vmul.f32 %v1646_v7, %v1382_v10 }
 0xeb6   : > { %v1408_v14 = vsel %vm642_vm2, %v1396_v12, 0.0 }
 0xf14   : > { %v1149_v27 = vpop.permute.xlu0 %1148 }
 0xf15   : > { %v1151_v26 = vmul.f32 %v1892_v25, %v1149_v27  ;;  %v1398_v27 = vmul.f32 %v1646_v7, %v1384_v22 }
 0xf17   : > { %1153 = vrot.lane.b32.xlu1 %v1151_v26, %s2015_s13 }
 0xf89   : > { %v1154_v29 = vpop.permute.xlu1 %1153 }
 0xf8a   : > { %v1156_v28 = vadd.f32 %v1154_v29, %v1146_v3  ;;  %v1414_v3 = vsel %vm642_vm2, %v1398_v27, 0.0 }
 0xf8c   : > { %1893 = vtanh.f32 %v1156_v28 }
 0xf99   : > { %v1894_v30 = vpop.eup %1893 }
 0xf9a   : > { %1159 = vrot.lane.b32.xlu0 %v1894_v30, %s2014_s12 }
0x100c   : > { %v1160_v31 = vpop.permute.xlu0 %1159 }
0x100d   : > { %v1162_v32 = vmul.f32 %v1892_v25, %v1160_v31  ;;  %v1405_v25 = vsel %vm642_vm2, %v1395_v24, 0.0 }
0x100f   : > { %1164 = vrot.lane.b32.xlu1 %v1162_v32, %s2015_s13 }
0x1081   : > { %v1165_v33 = vpop.permute.xlu1 %1164 }
0x1082   : > { %1168 = vst.msk [vmem:[#allocation3 + $0xa] sm:$0x3] %vm642_vm2, %v1165_v33  ;;  %1773 = vmatmul.mubr.msk.f32.vlgmr.msra.gmra.mxu1 %vm539_vm3, %v1165_v33 }
0x1089   : > { %v1385_v16 = vld [vmem:[#allocation3 + $0xa] sm:$0x3] }
0x108a   : > { %v1399_v18 = vmul.f32 %v1646_v7, %v1385_v16 }
0x108c   : > { %v1417_v19 = vsel %vm642_vm2, %v1399_v18, 0.0 }
0x1142   : > { %v1239_v35 = vpop.f32.mrf.mxu1 }
0x1143   : > { %v1243_v36 = vadd.f32 %v1239_v35, %v1170_v34 }
0x1144   : > { %v1774_v37 = vpop.f32.mrf.mxu1 }
0x1145   : > { %1895 = vtanh.f32 %v1243_v36  ;;  %v1643_v39 = vmul.f32 -1.442695, %v1243_v36  ;;  %v1446_v36 = vand.u32 127, %v377_v0  ;;  %v1428_v37 = vstv %s1787_s28 }
0x1147   : > { %1897 = vpow2.f32 %v1643_v39 }
0x1152   : > { %v1896_v38 = vpop.eup %1895 }
0x1153   : > { %1253 = vrot.lane.b32.xlu0 %v1896_v38, %s2014_s12 }
0x1154   : > { %v1898_v40 = vpop.eup %1897 }
0x1155   : > { %v1247_v41 = vadd.f32 1.0, %v1898_v40  ;;  %v1449_v40 = vsub.s32 %v1446_v36, %v2167_v4 }
0x1157   : > { %1899 = vrcp.f32 %v1247_v41 }
0x1164   : > { %v1900_v42 = vpop.eup %1899 }
0x1165   : > { %v1251_v45 = vmul.f32 %v1900_v42, %v1156_v28 }
0x11c5   : > { %v1254_v43 = vpop.permute.xlu0 %1253 }
0x11c6   : > { %v1256_v44 = vmul.f32 %v1900_v42, %v1254_v43 }
0x11c8   : > { %1258 = vrot.lane.b32.xlu1 %v1256_v44, %s2015_s13 }
0x123a   : > { %v1259_v46 = vpop.permute.xlu1 %1258 }
0x123b   : > { %v1261_v47 = vadd.f32 %v1259_v46, %v1251_v45 }
0x123d   : > { %1901 = vtanh.f32 %v1261_v47 }
0x124a   : > { %v1902_v48 = vpop.eup %1901 }
0x124b   : > { %1264 = vrot.lane.b32.xlu0 %v1902_v48, %s2014_s12 }
0x12bd   : > { %v1265_v49 = vpop.permute.xlu0 %1264 }
0x12be   : > { %v1267_v50 = vmul.f32 %v1900_v42, %v1265_v49 }
0x12c0   : > { %1269 = vrot.lane.b32.xlu1 %v1267_v50, %s2015_s13 }
0x1332   : > { %v1270_v51 = vpop.permute.xlu1 %1269 }
0x1333   : > { %1273 = vst.msk [vmem:[#allocation3 + $0xc] sm:$0x3] %vm642_vm2, %v1270_v51  ;;  %1784 = vmatmul.mubr.msk.f32.vlgmr.msra.gmra.mxu0 %vm539_vm3, %v1270_v51 }
0x133a   : > { %v1386_v26 = vld [vmem:[#allocation3 + $0xc] sm:$0x3] }
0x133b   : > { %v1400_v29 = vmul.f32 %v1646_v7, %v1386_v26 }
0x133d   : > { %v1420_v28 = vsel %vm642_vm2, %v1400_v29, 0.0 }
0x13f3   : > { %v1344_v53 = vpop.f32.mrf.mxu0 }
0x13f4   : > { %v1348_v54 = vadd.f32 %v1344_v53, %v1275_v52 }
0x13f5   : > { %v1785_v55 = vpop.f32.mrf.mxu0 }
0x13f6   : > { %1903 = vtanh.f32 %v1348_v54  ;;  %v1645_v57 = vmul.f32 -1.442695, %v1348_v54 }
0x13f8   : > { %1905 = vpow2.f32 %v1645_v57 }
0x1403   : > { %v1904_v56 = vpop.eup %1903 }
0x1404   : > { %1358 = vrot.lane.b32.xlu0 %v1904_v56, %s2014_s12 }
0x1405   : > { %v1906_v58 = vpop.eup %1905 }
0x1406   : > { %v1352_v59 = vadd.f32 1.0, %v1906_v58 }
0x1408   : > { %1907 = vrcp.f32 %v1352_v59 }
0x1415   : > { %v1908_v60 = vpop.eup %1907 }
0x1416   : > { %v1356_v63 = vmul.f32 %v1908_v60, %v1261_v47 }
0x1476   : > { %v1359_v61 = vpop.permute.xlu0 %1358 }
0x1477   : > { %v1361_v62 = vmul.f32 %v1908_v60, %v1359_v61 }
0x1479   : > { %1363 = vrot.lane.b32.xlu1 %v1361_v62, %s2015_s13 }
0x14eb   : > { %v1364_v1 = vpop.permute.xlu1 %1363 }
0x14ec   : > { %v1366_v2 = vadd.f32 %v1364_v1, %v1356_v63 }
0x14ee   : > { %1909 = vtanh.f32 %v1366_v2 }
0x14fb   : > { %v1910_v6 = vpop.eup %1909 }
0x14fc   : > { %1369 = vrot.lane.b32.xlu0 %v1910_v6, %s2014_s12 }
0x151b   : > { %1403 = vadd.xlane.f32.xlu0 %v1402_v11 }
0x151f   : > { %1409 = vadd.xlane.f32.xlu0 %v1408_v14 }
0x1523   : > { %1412 = vadd.xlane.f32.xlu0 %v1411_v17 }
0x1527   : > { %1418 = vadd.xlane.f32.xlu0 %v1417_v19 }
0x156e   : > { %v1370_v20 = vpop.permute.xlu0 %1369 }
0x156f   : > { %v1372_v21 = vmul.f32 %v1908_v60, %v1370_v20 }
0x1571   : > { %1374 = vrot.lane.b32.xlu1 %v1372_v21, %s2015_s13 }
0x1595   : > { %1406 = vadd.xlane.f32.xlu1 %v1405_v25 }
0x1599   : > { %1415 = vadd.xlane.f32.xlu1 %v1414_v3 }
0x159d   : > { %1421 = vadd.xlane.f32.xlu1 %v1420_v28 }
0x15a4   : > { %v1404_v34 = vpop.xlane.xlu0 %1403 }
0x15a5   : > { %v1429_v41 = vadd.f32 %v1428_v37, %v1404_v34 }
0x15a7   : > { %v1450_v46 = vrot.slane %v1429_v41, %v1449_v40 }
0x15a8   : > { %v1410_v38 = vpop.xlane.xlu0 %1409 }
0x15a9   : > { %v1431_v44 = vadd.f32 %v1428_v37, %v1410_v38 }
0x15ab   : > { %v1458_v49 = vrot.slane %v1431_v44, %v1449_v40 }
0x15ac   : > { %v1413_v45 = vpop.xlane.xlu0 %1412 }
0x15ad   : > { %v1432_v47 = vadd.f32 %v1428_v37, %v1413_v45 }
0x15af   : > { %v1462_v53 = vrot.slane %v1432_v47, %v1449_v40 }
0x15b0   : > { %v1419_v52 = vpop.xlane.xlu0 %1418 }
0x15b1   : > { %v1434_v55 = vadd.f32 %v1428_v37, %v1419_v52 }
0x15b3   : > { %v1470_v60 = vrot.slane %v1434_v55, %v1449_v40 }
0x15e3   : > { %v1375_v30 = vpop.permute.xlu1 %1374 }
0x15e4   : > { %1378 = vst.msk [vmem:[#allocation3 + $0xe] sm:$0x3] %vm642_vm2, %v1375_v30 }
0x15eb   : > { %v1387_v31 = vld [vmem:[#allocation3 + $0xe] sm:$0x3] }
0x15ec   : > { %v1401_v32 = vmul.f32 %v1646_v7, %v1387_v31 }
0x15ee   : > { %v1423_v33 = vsel %vm642_vm2, %v1401_v32, 0.0 }
0x15ef   : > { %1424 = vadd.xlane.f32.xlu0 %v1423_v33 }
0x161e   : > { %v1407_v35 = vpop.xlane.xlu1 %1406 }
0x161f   : > { %v1430_v39 = vadd.f32 %v1428_v37, %v1407_v35 }
0x1621   : > { %v1454_v42 = vrot.slane %v1430_v39, %v1449_v40 }
0x1622   : > { %v1416_v43 = vpop.xlane.xlu1 %1415 }
0x1623   : > { %v1480_v48 = vsel %vm1479_vm4, %v1454_v42, %v1450_v46  ;;  %v1433_v50 = vadd.f32 %v1428_v37, %v1416_v43 }
0x1624   : > { %v1482_v0 = vsel %vm1481_vm5, %v1458_v49, %v1480_v48 }
0x1625   : > { %v1466_v54 = vrot.slane %v1433_v50, %v1449_v40  ;;  %v1484_v56 = vsel %vm1483_vm6, %v1462_v53, %v1482_v0 }
0x1626   : > { %v1422_v51 = vpop.xlane.xlu1 %1421 }
0x1627   : > { %v1435_v4 = vadd.f32 %v1428_v37, %v1422_v51  ;;  %v1486_v57 = vsel %vm1485_vm7, %v1466_v54, %v1484_v56 }
0x1628   : > { %v1488_v62 = vsel %vm1487_vm8, %v1470_v60, %v1486_v57 }
0x1629   : > { %v1474_v58 = vrot.slane %v1435_v4, %v1449_v40 }
0x162b   : > { %v1490_v1 = vsel %vm1489_vm9, %v1474_v58, %v1488_v62 }
0x1678   : > { %v1425_v59 = vpop.xlane.xlu0 %1424 }
0x1679   : > { %v1436_v61 = vadd.f32 %v1428_v37, %v1425_v59 }
0x167b   : > { %v1478_v63 = vrot.slane %v1436_v61, %v1449_v40 }
0x167d   : > { %v1492_v2 = vsel %vm1491_vm10, %v1478_v63, %v1490_v1 }
0x167e   : > { %1495 = vst.msk [vmem:[%s343_s10] sm:$0xff] %vm1494_vm11, %v1492_v2 }
0x167f PF: > { %p17_p5 = scmp.ge.s32.totalorder %s2095_s7, 5   ;;  %s2383_s21 = smov %s1995_s22 }
0x1680   : > { %s2384_s22 = smov %s1999_s23  ;;  %s2385_s23 = smov %s2112_s15 }
0x1681   : > { %s2386_s24 = smov %s2095_s7  ;;  %19 = sbr.rel (!%p17_p5) target bundleno = 4 (0x4), region = 115 }
0x1686   :  { %1515 = vsyncpa [#allocation5], 1 }
0x1687   :  { %1517 = vsyncpa [#allocation5 + $0x1], 1 }
0x1688   :  { %1518 = vsyncpa [#allocation7], 1 }
0x1689   :  { %1520 = vsyncpa [#allocation7 + $0x1], 1 }

</bundles_post_ra>
